<compile_context>
chip_gen: v7x
topology: tpu7x:2x2x1
jax: 0.10.0
libtpu: 0.0.40
codegen_flags: <defaults>
</compile_context>

<pallas_src>
import functools

import jax
import jax.numpy as jnp
from jax import lax
from jax.experimental import pallas as pl
from jax.experimental.pallas import tpu as pltpu

LN_EPS = 1e-5              # torch.nn.LayerNorm default eps
MXU_DTYPE = jnp.bfloat16   # MXU operand dtype (f32 accumulation everywhere)


def _round_up(v, m):
    return (v + m - 1) // m * m


def _pick_row_tile(n_pad):
    # Biggest row tile that divides n_pad; 512 is the v5e/v6e sweet spot.
    for tm in (512, 256, 128):
        if n_pad % tm == 0:
            return tm
    return n_pad


# ----------------------------- fused encoder kernel -----------------------------

def _encoder_kernel(a_ref, p_ref, x_ref, wcat_ref, cw_ref, cv_ref, sb_ref,
                    h_ref, g_ref,
                    acc_ref, uw_ref, gacc_ref,
                    *, d_model, d_pad, tm):
    """One grid step = (layer l, node-row tile j).

    a_ref   : (TM, Np)     bf16  row tile of GCN-normalized adjacency (streamed)
    p_ref   : (Gp, TM)     bf16  column tile of the average-pooling matrix
    x_ref   : (Np, Dp)     bf16  node features (resident; only read at (0, 0))
    wcat_ref: (Dp, 2*Dp)   bf16  [W_conv0 | W_skip]
    cw_ref  : (1, Dp, Dp)  bf16  this layer's GCNConv weight
    cv_ref  : (1, 3, Dp)   f32   this layer's [bias, ln_gamma, ln_beta]
    sb_ref  : (1, Dp)      f32   fc_skip bias
    h_ref   : (TM, Dp)     f32   node-output tile   (written at the last layer)
    g_ref   : (Gp, Dp)     f32   pooled graph output (written at the very last step)
    acc_ref : (Np, Dp)     f32   running skip-sum  u = fc_skip(X) + sum_i h_i
    uw_ref  : (Np, Dp)     bf16  per-layer transform  u @ W_l  (aggregation RHS)
    gacc_ref: (Gp, Dp)     f32   pooled-readout accumulator
    """
    l = pl.program_id(0)
    j = pl.program_id(1)
    last_l = pl.num_programs(0) - 1
    last_j = pl.num_programs(1) - 1

    # ---- once per layer (row tile 0): dense transform for ALL node rows ---------
    @pl.when((j == 0) & (l == 0))
    def _():
        # Single MXU pass over X:  X @ [W0 | W_skip]  -> (Np, 2*Dp), f32 accumulation.
        z = jnp.dot(x_ref[...], wcat_ref[...], preferred_element_type=jnp.float32)
        uw_ref[...] = z[:, :d_pad].astype(MXU_DTYPE)          # X @ W0
        acc_ref[...] = z[:, d_pad:] + sb_ref[...]             # fc_skip(X) seeds skip-sum

    @pl.when((j == 0) & (l > 0))
    def _():
        uw_ref[...] = jnp.dot(acc_ref[...].astype(MXU_DTYPE), cw_ref[0],
                              preferred_element_type=jnp.float32).astype(MXU_DTYPE)

    @pl.when((j == 0) & (l == last_l))
    def _():
        gacc_ref[...] = jnp.zeros_like(gacc_ref)

    # ---- per row tile: aggregate + bias + LayerNorm + ReLU -----------------------
    vec = cv_ref[0]                                   # (3, Dp) f32
    bias, gamma, beta = vec[0:1], vec[1:2], vec[2:3]

    # GCNConv: A_hat[rows, :] @ (u @ W_l) + b   (bf16 MXU operands, f32 accumulation)
    h = jnp.dot(a_ref[...], uw_ref[...], preferred_element_type=jnp.float32) + bias

    # LayerNorm over the d_model real features.  Padded lanes of h are exactly 0
    # (zero-padded W / bias), so the mean needs no lane mask; mask only the centered
    # values so padded lanes don't pollute the variance.
    inv_d = 1.0 / d_model
    lane = lax.broadcasted_iota(jnp.int32, (1, d_pad), 1)
    lane_mask = (lane < d_model).astype(jnp.float32)
    mu = jnp.sum(h, axis=-1, keepdims=True) * inv_d
    cen = (h - mu) * lane_mask
    var = jnp.sum(cen * cen, axis=-1, keepdims=True) * inv_d
    h = cen * lax.rsqrt(var + LN_EPS) * gamma + beta
    h = jnp.maximum(h, 0.0)                           # activation = ReLU

    # Running skip-sum for the next layer (this tile's rows only; within a layer no
    # other tile reads these rows because uw was frozen at tile 0).
    row0 = pl.multiple_of(j * tm, tm)
    acc_ref[pl.ds(row0, tm), :] = acc_ref[pl.ds(row0, tm), :] + h

    # ---- outputs at the last layer ------------------------------------------------
    @pl.when(l == last_l)
    def _():
        h_ref[...] = h
        gacc_ref[...] += jnp.dot(p_ref[...], h.astype(MXU_DTYPE),
                                 preferred_element_type=jnp.float32)

    @pl.when((l == last_l) & (j == last_j))
    def _():
        g_ref[...] = gacc_ref[...]


def encoder_forward(packed, x_pad, a_pad, p_pad, *, k, d_model):
    n_pad, d_pad = x_pad.shape
    g_pad = p_pad.shape[0]
    tm = _pick_row_tile(n_pad)
    num_tiles = n_pad // tm

    kernel = functools.partial(_encoder_kernel, d_model=d_model, d_pad=d_pad, tm=tm)

    in_specs = [
        pl.BlockSpec((tm, n_pad), lambda l, j: (j, 0)),            # A row tile (streamed)
        pl.BlockSpec((g_pad, tm), lambda l, j: (0, j)),            # P column tile
        pl.BlockSpec((n_pad, d_pad), lambda l, j: (0, 0)),         # X (resident)
        pl.BlockSpec((d_pad, 2 * d_pad), lambda l, j: (0, 0)),     # [W0 | W_skip]
        pl.BlockSpec((1, d_pad, d_pad), lambda l, j: (l, 0, 0)),   # W_l
        pl.BlockSpec((1, 3, d_pad), lambda l, j: (l, 0, 0)),       # [b, gamma, beta]_l
        pl.BlockSpec((1, d_pad), lambda l, j: (0, 0)),             # fc_skip bias
    ]
    out_specs = (
        pl.BlockSpec((tm, d_pad), lambda l, j: (j, 0)),            # h  (node embeddings)
        pl.BlockSpec((g_pad, d_pad), lambda l, j: (0, 0)),         # g  (pooled readout)
    )
    scratch_shapes = [
        pltpu.VMEM((n_pad, d_pad), jnp.float32),   # acc : running skip-sum
        pltpu.VMEM((n_pad, d_pad), MXU_DTYPE),     # uw  : per-layer transform u @ W_l
        pltpu.VMEM((g_pad, d_pad), jnp.float32),   # pooled-readout accumulator
    ]

    # VMEM budget: double-buffered pipeline blocks + resident inputs + scratch, plus
    # headroom for the (Np, 2*Dp) layer-0 transform intermediate.
    bf2, f4 = 2, 4
    vmem_bytes = (
        2 * tm * n_pad * bf2            # A blocks
        + 2 * g_pad * tm * bf2          # P blocks
        + 2 * n_pad * d_pad * bf2       # X
        + 2 * d_pad * 2 * d_pad * bf2   # [W0 | W_skip]
        + 2 * d_pad * d_pad * bf2       # W_l blocks
        + 2 * 3 * d_pad * f4            # [b, gamma, beta] blocks
        + 2 * d_pad * f4                # fc_skip bias
        + 2 * tm * d_pad * f4           # h output blocks
        + 2 * g_pad * d_pad * f4        # g output
        + n_pad * d_pad * f4            # acc scratch
        + n_pad * d_pad * bf2           # uw scratch
        + g_pad * d_pad * f4            # gacc scratch
        + n_pad * 2 * d_pad * f4        # layer-0 transform intermediate
    )
    vmem_limit = int(min(2 * vmem_bytes + (8 << 20), 100 << 20))

    cost = pl.CostEstimate(
        flops=(2 * k * n_pad * n_pad * d_pad        # A @ (u W) aggregation
               + 2 * k * n_pad * d_pad * d_pad      # per-layer dense transforms
               + 2 * n_pad * d_pad * d_pad          # fc_skip
               + 2 * g_pad * n_pad * d_pad),        # pooled readout
        transcendentals=k * n_pad,                  # one rsqrt per row per layer
        bytes_accessed=(k * n_pad * n_pad * bf2 + g_pad * n_pad * bf2
                        + n_pad * d_pad * bf2 + d_pad * 2 * d_pad * bf2
                        + k * (d_pad * d_pad * bf2 + 3 * d_pad * f4)
                        + k * n_pad * d_pad * f4 + g_pad * d_pad * f4),
    )

    return pl.pallas_call(
        kernel,
        grid_spec=pltpu.PrefetchScalarGridSpec(
            num_scalar_prefetch=0,
            grid=(k, num_tiles),
            in_specs=in_specs,
            out_specs=out_specs,
            scratch_shapes=scratch_shapes),
        out_shape=(jax.ShapeDtypeStruct((n_pad, d_pad), jnp.float32),
                   jax.ShapeDtypeStruct((g_pad, d_pad), jnp.float32)),
        compiler_params=pltpu.CompilerParams(
            # Layer axis and row axis are both sequential: layer l reads the full acc
            # written by layer l-1, and tile 0 of each layer writes uw read by the rest.
            dimension_semantics=("arbitrary", "arbitrary"),
            vmem_limit_bytes=vmem_limit),
        cost_estimate=cost,
    )(a_pad, p_pad, x_pad,
      packed["wcat"], packed["conv_w"], packed["conv_vec"], packed["skip_b"])


# ---------------------------------- JAX glue ------------------------------------

def build_gcn_adj_padded(edge_index, num_nodes, n_pad):
    """Dense GCN-normalized adjacency D^-1/2 (A + I) D^-1/2, built directly at the
    padded shape and emitted in bf16 (padded rows/cols stay exactly zero)."""
    src, dst = edge_index[0], edge_index[1]
    adj = jnp.zeros((n_pad, n_pad), jnp.float32)
    adj = adj.at[dst, src].add(1.0)                       # message src -> dst
    node = jnp.arange(num_nodes)
    adj = adj.at[node, node].add(1.0)                     # self loops (valid nodes only)
    deg = jnp.sum(adj, axis=1)
    dinv = lax.rsqrt(jnp.maximum(deg, 1e-12))             # padded rows: deg=0, row stays 0
    return (dinv[:, None] * adj * dinv[None, :]).astype(MXU_DTYPE)


def build_pool_mat_padded(ptr, num_nodes, n_pad, g_pad):
    """AvgPooling readout as a matmul: P[g, n] = 1/|segment g| for n in segment g."""
    num_graphs = ptr.shape[0] - 1
    starts = jnp.full((g_pad,), n_pad, dtype=ptr.dtype).at[:num_graphs].set(ptr[:-1])
    ends = jnp.full((g_pad,), n_pad, dtype=ptr.dtype).at[:num_graphs].set(ptr[1:])
    node = jnp.arange(n_pad)
    mask = (node[None, :] >= starts[:, None]) & (node[None, :] < ends[:, None])
    counts = jnp.maximum((ends - starts).astype(jnp.float32), 1.0)
    return (mask.astype(jnp.float32) / counts[:, None]).astype(MXU_DTYPE)


def bgrl_forward(params, x_tok, edge_index_x, ptr_x,
                 y_tok, edge_index_y, ptr_y, *, n_layers, d_model):
    # PairWiseLearning_BGRL.forward only uses the x-view; nn.Dropout is identity (eval).
    del y_tok, edge_index_y, ptr_y
    emb_x = params["emb"][x_tok]                          # (N, d_model) embedding gather

    n = emb_x.shape[0]
    d_pad = _round_up(d_model, 128)
    n_pad = _round_up(n, 128)                             # lane-dense node dim (A / P last dim)
    num_graphs = ptr_x.shape[0] - 1
    g_pad = _round_up(num_graphs, 16)                     # bf16 (16,128) sublane tile

    x_pad = jnp.zeros((n_pad, d_pad), MXU_DTYPE).at[:n, :d_model].set(
        emb_x.astype(MXU_DTYPE))
    a_pad = build_gcn_adj_padded(edge_index_x, n, n_pad)
    p_pad = build_pool_mat_padded(ptr_x, n, n_pad, g_pad)

    h_pad, g_readout_pad = encoder_forward(
        params["encoder"], x_pad, a_pad, p_pad, k=n_layers, d_model=d_model)

    return h_pad[:n, :d_model], g_readout_pad[:num_graphs, :d_model]


# ------------------------------- parameter init ---------------------------------

def init_params(key, n_vocab, d_model, n_layers):
    assert n_layers >= 2
    d_pad = _round_up(d_model, 128)
    keys = iter(jax.random.split(key, 4 * n_layers + 8))

    def rand_w():
        return 0.1 * jax.random.normal(next(keys), (d_model, d_model), jnp.float32)

    def rand_b():
        return 0.01 * jax.random.normal(next(keys), (d_model,), jnp.float32)

    raw = {"conv_w": [rand_w() for _ in range(n_layers)],
           "conv_b": [rand_b() for _ in range(n_layers)],
           "ln_g": [jnp.ones((d_model,), jnp.float32) for _ in range(n_layers)],
           "ln_b": [jnp.zeros((d_model,), jnp.float32) for _ in range(n_layers)],
           "skip_w": rand_w(),
           "skip_b": rand_b()}

    # NOTE: padded regions MUST stay exactly zero — the kernel's LayerNorm mean and the
    # zero padded output lanes rely on it.
    def pad_mat(w):
        return jnp.zeros((d_pad, d_pad), jnp.float32).at[:d_model, :d_model].set(w)

    def pad_vec(v):
        return jnp.zeros((1, d_pad), jnp.float32).at[0, :d_model].set(v)

    wcat = jnp.zeros((d_pad, 2 * d_pad), jnp.float32)
    wcat = wcat.at[:d_model, :d_model].set(raw["conv_w"][0])
    wcat = wcat.at[:d_model, d_pad:d_pad + d_model].set(raw["skip_w"])

    conv_w = jnp.stack([pad_mat(w) for w in raw["conv_w"]])            # (k, Dp, Dp)
    conv_vec = jnp.stack([                                             # (k, 3, Dp)
        jnp.concatenate([pad_vec(raw["conv_b"][i]),
                         pad_vec(raw["ln_g"][i]),
                         pad_vec(raw["ln_b"][i])], axis=0)
        for i in range(n_layers)])

    packed = {"wcat": wcat.astype(MXU_DTYPE),
              "conv_w": conv_w.astype(MXU_DTYPE),
              "conv_vec": conv_vec,
              "skip_b": pad_vec(raw["skip_b"])}

    emb = 0.1 * jax.random.normal(next(keys), (n_vocab, d_model), jnp.float32)
    return {"emb": emb, "encoder": packed}, raw


# ------------------------------ pure-JAX reference --------------------------------

def _reference_forward(params, raw, x_tok, edge_index, ptr, *, n_layers, d_model):
    emb = params["emb"][x_tok]
    n = emb.shape[0]
    src, dst = edge_index[0], edge_index[1]
    adj = jnp.zeros((n, n), jnp.float32).at[dst, src].add(1.0) + jnp.eye(n, dtype=jnp.float32)
    dinv = lax.rsqrt(jnp.sum(adj, axis=1))
    a = dinv[:, None] * adj * dinv[None, :]

    def layer(u, i):
        h = a @ (u @ raw["conv_w"][i]) + raw["conv_b"][i]
        mu = jnp.mean(h, axis=-1, keepdims=True)
        var = jnp.mean((h - mu) ** 2, axis=-1, keepdims=True)
        h = (h - mu) * lax.rsqrt(var + LN_EPS) * raw["ln_g"][i] + raw["ln_b"][i]
        return jnp.maximum(h, 0.0)

    h = layer(emb, 0)
    acc = emb @ raw["skip_w"] + raw["skip_b"] + h
    for i in range(1, n_layers):
        h = layer(acc, i)
        acc = acc + h

    num_graphs = ptr.shape[0] - 1
    g = jnp.stack([jnp.mean(h[int(ptr[i]):int(ptr[i + 1])], axis=0)
                   for i in range(num_graphs)])
    return h, g


# ------------------------------------ main ---------------------------------------

if __name__ == "__main__":
    n_vocab, d_model, n_layers = 20, 32, 2
    num_nodes, num_graphs = 16, 2

    key = jax.random.PRNGKey(0)
    pkey, xkey, ykey = jax.random.split(key, 3)

    params, raw = init_params(pkey, n_vocab, d_model, n_layers)

    x_tok = jax.random.randint(xkey, (num_nodes,), 0, n_vocab)
    y_tok = jax.random.randint(ykey, (num_nodes,), 0, n_vocab)   # unused by forward()

    # two 8-node ring graphs
    src = jnp.arange(num_nodes, dtype=jnp.int32)
    dst = jnp.where(src % 8 == 7, src - 7, src + 1).astype(jnp.int32)
    edge_index = jnp.stack([src, dst])
    ptr = jnp.array([0, 8, 16], dtype=jnp.int32)

    fwd = jax.jit(functools.partial(bgrl_forward, n_layers=n_layers, d_model=d_model))
    h, g = fwd(params, x_tok, edge_index, ptr, y_tok, edge_index, ptr)
    jax.block_until_ready((h, g))

    assert h.shape == (num_nodes, d_model)
    assert g.shape == (num_graphs, d_model)
    assert bool(jnp.all(jnp.isfinite(h))) and bool(jnp.all(jnp.isfinite(g)))

    # f32 reference; kernel uses bf16 MXU operands with f32 accumulation -> loose tol.
    h_ref, g_ref = _reference_forward(params, raw, x_tok, edge_index, ptr,
                                      n_layers=n_layers, d_model=d_model)
    assert bool(jnp.allclose(h, h_ref, atol=1e-1, rtol=1e-1)), \
        float(jnp.max(jnp.abs(h - h_ref)))
    assert bool(jnp.allclose(g, g_ref, atol=1e-1, rtol=1e-1)), \
        float(jnp.max(jnp.abs(g - g_ref)))

    print("KERNEL_OK")
</pallas_src>

<mosaic_0001>
module attributes {stable_mosaic.version = 11 : i64} {
  func.func private @main(%arg0: i32) attributes {dimension_semantics = [#tpu.dimension_semantics<core_parallel>], iteration_bounds = array<i64: 2>, tpu.core_type = #tpu.core_type<sc_scalar_subcore>, window_params = []} {
    return
  }
}

module attributes {stable_mosaic.version = 11 : i64} {
  func.func private @main(%arg0: i32) attributes {dimension_semantics = [#tpu.dimension_semantics<core_parallel>], iteration_bounds = array<i64: 2>, tpu.core_type = #tpu.core_type<sc_scalar_subcore>, window_params = []} {
    return
  }
}

module attributes {stable_mosaic.version = 11 : i64} {
  func.func @_encoder_kernel(%arg0: i32, %arg1: i32, %arg2: memref<128x128xbf16, #tpu.memory_space<vmem>>, %arg3: memref<16x128xbf16, #tpu.memory_space<vmem>>, %arg4: memref<128x128xbf16, #tpu.memory_space<vmem>>, %arg5: memref<128x256xbf16, #tpu.memory_space<vmem>>, %arg6: memref<1x128x128xbf16, #tpu.memory_space<vmem>>, %arg7: memref<1x3x128xf32, #tpu.memory_space<vmem>>, %arg8: memref<1x128xf32, #tpu.memory_space<vmem>>, %arg9: memref<128x128xf32, #tpu.memory_space<vmem>>, %arg10: memref<16x128xf32, #tpu.memory_space<vmem>>, %arg11: memref<128x128xf32, #tpu.memory_space<vmem>>, %arg12: memref<128x128xbf16, #tpu.memory_space<vmem>>, %arg13: memref<16x128xf32, #tpu.memory_space<vmem>>) attributes {dimension_semantics = [#tpu.dimension_semantics<arbitrary>, #tpu.dimension_semantics<arbitrary>], iteration_bounds = array<i64: 2, 1>, scalar_prefetch = 0 : i64, scratch_operands = 3 : i64, tpu.core_type = #tpu.core_type<tc>, window_params = [{transform_indices = @transform_0, window_bounds = array<i64: 128, 128>}, {transform_indices = @transform_1, window_bounds = array<i64: 16, 128>}, {pipeline_mode = #tpu.pipeline_mode<synchronous>, transform_indices = @transform_2, window_bounds = array<i64: 128, 128>}, {pipeline_mode = #tpu.pipeline_mode<synchronous>, transform_indices = @transform_3, window_bounds = array<i64: 128, 256>}, {transform_indices = @transform_4, window_bounds = array<i64: 1, 128, 128>}, {transform_indices = @transform_5, window_bounds = array<i64: 1, 3, 128>}, {pipeline_mode = #tpu.pipeline_mode<synchronous>, transform_indices = @transform_6, window_bounds = array<i64: 1, 128>}, {transform_indices = @transform_7, window_bounds = array<i64: 128, 128>}, {pipeline_mode = #tpu.pipeline_mode<synchronous>, transform_indices = @transform_8, window_bounds = array<i64: 16, 128>}]} {
    %c0_i32 = arith.constant 0 : i32
    %0 = arith.cmpi eq, %arg1, %c0_i32 : i32
    %c0_i32_0 = arith.constant 0 : i32
    %1 = arith.cmpi eq, %arg0, %c0_i32_0 : i32
    %2 = arith.andi %0, %1 : i1
    %3 = arith.extui %2 : i1 to i32
    %c0_i32_1 = arith.constant 0 : i32
    %4 = arith.cmpi ne, %3, %c0_i32_1 : i32
    scf.if %4 {
      %c0_26 = arith.constant 0 : index
      %c0_27 = arith.constant 0 : index
      %69 = vector.load %arg4[%c0_26, %c0_27] : memref<128x128xbf16, #tpu.memory_space<vmem>>, vector<128x128xbf16>
      %c0_28 = arith.constant 0 : index
      %c0_29 = arith.constant 0 : index
      %70 = vector.load %arg5[%c0_28, %c0_29] : memref<128x256xbf16, #tpu.memory_space<vmem>>, vector<128x256xbf16>
      %cst_30 = arith.constant dense<0.000000e+00> : vector<128x256xf32>
      %71 = tpu.matmul %69, %70, %cst_30 {dimension_numbers = #tpu.dot_dimension_numbers<[1], [0], [0], [1], [0, 0, 1, 1], [], []>} : vector<128x128xbf16>, vector<128x256xbf16>, vector<128x256xf32> -> vector<128x256xf32>
      %72 = vector.extract_strided_slice %71 {offsets = [0, 0], sizes = [128, 128], strides = [1, 1]} : vector<128x256xf32> to vector<128x128xf32>
      %73 = arith.truncf %72 : vector<128x128xf32> to vector<128x128xbf16>
      %c0_31 = arith.constant 0 : index
      %c0_32 = arith.constant 0 : index
      %74 = vector.load %arg12[%c0_31, %c0_32] : memref<128x128xbf16, #tpu.memory_space<vmem>>, vector<128x128xbf16>
      tpu.vector_store %arg12[%c0_31, %c0_32], %73 {strides = array<i32>} : memref<128x128xbf16, #tpu.memory_space<vmem>>, vector<128x128xbf16>,
      %75 = vector.extract_strided_slice %71 {offsets = [0, 128], sizes = [128, 128], strides = [1, 1]} : vector<128x256xf32> to vector<128x128xf32>
      %c0_33 = arith.constant 0 : index
      %c0_34 = arith.constant 0 : index
      %76 = vector.load %arg8[%c0_33, %c0_34] : memref<1x128xf32, #tpu.memory_space<vmem>>, vector<1x128xf32>
      %77 = vector.broadcast %76 : vector<1x128xf32> to vector<128x128xf32>
      %78 = arith.addf %75, %77 : vector<128x128xf32>
      %c0_35 = arith.constant 0 : index
      %c0_36 = arith.constant 0 : index
      %79 = vector.load %arg11[%c0_35, %c0_36] : memref<128x128xf32, #tpu.memory_space<vmem>>, vector<128x128xf32>
      tpu.vector_store %arg11[%c0_35, %c0_36], %78 {strides = array<i32>} : memref<128x128xf32, #tpu.memory_space<vmem>>, vector<128x128xf32>,
    } else {
    }
    %c0_i32_2 = arith.constant 0 : i32
    %5 = arith.cmpi eq, %arg1, %c0_i32_2 : i32
    %c0_i32_3 = arith.constant 0 : i32
    %6 = arith.cmpi sgt, %arg0, %c0_i32_3 : i32
    %7 = arith.andi %5, %6 : i1
    %8 = arith.extui %7 : i1 to i32
    %c0_i32_4 = arith.constant 0 : i32
    %9 = arith.cmpi ne, %8, %c0_i32_4 : i32
    scf.if %9 {
      %c0_26 = arith.constant 0 : index
      %c0_27 = arith.constant 0 : index
      %69 = vector.load %arg11[%c0_26, %c0_27] : memref<128x128xf32, #tpu.memory_space<vmem>>, vector<128x128xf32>
      %70 = arith.truncf %69 : vector<128x128xf32> to vector<128x128xbf16>
      %c0_28 = arith.constant 0 : index
      %c0_29 = arith.constant 0 : index
      %c0_30 = arith.constant 0 : index
      %71 = vector.load %arg6[%c0_28, %c0_29, %c0_30] : memref<1x128x128xbf16, #tpu.memory_space<vmem>>, vector<1x128x128xbf16>
      %72 = vector.shape_cast %71 : vector<1x128x128xbf16> to vector<128x128xbf16>
      %cst_31 = arith.constant dense<0.000000e+00> : vector<128x128xf32>
      %73 = tpu.matmul %70, %72, %cst_31 {dimension_numbers = #tpu.dot_dimension_numbers<[1], [0], [0], [1], [0, 0, 1, 1], [], []>} : vector<128x128xbf16>, vector<128x128xbf16>, vector<128x128xf32> -> vector<128x128xf32>
      %74 = arith.truncf %73 : vector<128x128xf32> to vector<128x128xbf16>
      %c0_32 = arith.constant 0 : index
      %c0_33 = arith.constant 0 : index
      %75 = vector.load %arg12[%c0_32, %c0_33] : memref<128x128xbf16, #tpu.memory_space<vmem>>, vector<128x128xbf16>
      tpu.vector_store %arg12[%c0_32, %c0_33], %74 {strides = array<i32>} : memref<128x128xbf16, #tpu.memory_space<vmem>>, vector<128x128xbf16>,
    } else {
    }
    %c0_i32_5 = arith.constant 0 : i32
    %10 = arith.cmpi eq, %arg1, %c0_i32_5 : i32
    %c1_i32 = arith.constant 1 : i32
    %11 = arith.cmpi eq, %arg0, %c1_i32 : i32
    %12 = arith.andi %10, %11 : i1
    %13 = arith.extui %12 : i1 to i32
    %c0_i32_6 = arith.constant 0 : i32
    %14 = arith.cmpi ne, %13, %c0_i32_6 : i32
    scf.if %14 {
      %cst_26 = arith.constant 0.000000e+00 : f32
      %69 = vector.broadcast %cst_26 : f32 to vector<16x128xf32>
      %c0_27 = arith.constant 0 : index
      %c0_28 = arith.constant 0 : index
      %70 = vector.load %arg13[%c0_27, %c0_28] : memref<16x128xf32, #tpu.memory_space<vmem>>, vector<16x128xf32>
      tpu.vector_store %arg13[%c0_27, %c0_28], %69 {strides = array<i32>} : memref<16x128xf32, #tpu.memory_space<vmem>>, vector<16x128xf32>,
    } else {
    }
    %c0 = arith.constant 0 : index
    %c0_7 = arith.constant 0 : index
    %c0_8 = arith.constant 0 : index
    %15 = vector.load %arg7[%c0, %c0_7, %c0_8] : memref<1x3x128xf32, #tpu.memory_space<vmem>>, vector<1x3x128xf32>
    %16 = vector.shape_cast %15 : vector<1x3x128xf32> to vector<3x128xf32>
    %17 = vector.extract_strided_slice %16 {offsets = [0, 0], sizes = [1, 128], strides = [1, 1]} : vector<3x128xf32> to vector<1x128xf32>
    %18 = vector.extract_strided_slice %16 {offsets = [1, 0], sizes = [1, 128], strides = [1, 1]} : vector<3x128xf32> to vector<1x128xf32>
    %19 = vector.extract_strided_slice %16 {offsets = [2, 0], sizes = [1, 128], strides = [1, 1]} : vector<3x128xf32> to vector<1x128xf32>
    %c0_9 = arith.constant 0 : index
    %c0_10 = arith.constant 0 : index
    %20 = vector.load %arg2[%c0_9, %c0_10] : memref<128x128xbf16, #tpu.memory_space<vmem>>, vector<128x128xbf16>
    %c0_11 = arith.constant 0 : index
    %c0_12 = arith.constant 0 : index
    %21 = vector.load %arg12[%c0_11, %c0_12] : memref<128x128xbf16, #tpu.memory_space<vmem>>, vector<128x128xbf16>
    %cst = arith.constant dense<0.000000e+00> : vector<128x128xf32>
    %22 = tpu.matmul %20, %21, %cst {dimension_numbers = #tpu.dot_dimension_numbers<[1], [0], [0], [1], [0, 0, 1, 1], [], []>} : vector<128x128xbf16>, vector<128x128xbf16>, vector<128x128xf32> -> vector<128x128xf32>
    %23 = vector.broadcast %17 : vector<1x128xf32> to vector<128x128xf32>
    %24 = arith.addf %22, %23 : vector<128x128xf32>
    %25 = tpu.iota {dimensions = array<i32: 1>} : vector<1x128xi32>
    %c32_i32 = arith.constant 32 : i32
    %26 = vector.broadcast %c32_i32 : i32 to vector<1x128xi32>
    %27 = arith.cmpi slt, %25, %26 : vector<1x128xi32>
    %28 = arith.extui %27 : vector<1x128xi1> to vector<1x128xi32>
    %29 = arith.sitofp %28 : vector<1x128xi32> to vector<1x128xf32>
    %cst_13 = arith.constant dense<0.000000e+00> : vector<128xf32>
    %30 = vector.multi_reduction <add>, %24, %cst_13 [1] : vector<128x128xf32> to vector<128xf32>
    %31 = vector.shape_cast %30 : vector<128xf32> to vector<128x1xf32>
    %cst_14 = arith.constant 3.125000e-02 : f32
    %32 = vector.broadcast %cst_14 : f32 to vector<128x1xf32>
    %33 = arith.mulf %31, %32 : vector<128x1xf32>
    %34 = vector.broadcast %33 : vector<128x1xf32> to vector<128x128xf32>
    %35 = arith.subf %24, %34 : vector<128x128xf32>
    %36 = vector.broadcast %29 : vector<1x128xf32> to vector<128x128xf32>
    %37 = arith.mulf %35, %36 : vector<128x128xf32>
    %38 = arith.mulf %37, %37 : vector<128x128xf32>
    %cst_15 = arith.constant dense<0.000000e+00> : vector<128xf32>
    %39 = vector.multi_reduction <add>, %38, %cst_15 [1] : vector<128x128xf32> to vector<128xf32>
    %40 = vector.shape_cast %39 : vector<128xf32> to vector<128x1xf32>
    %cst_16 = arith.constant 3.125000e-02 : f32
    %41 = vector.broadcast %cst_16 : f32 to vector<128x1xf32>
    %42 = arith.mulf %40, %41 : vector<128x1xf32>
    %cst_17 = arith.constant 9.99999974E-6 : f32
    %43 = vector.broadcast %cst_17 : f32 to vector<128x1xf32>
    %44 = arith.addf %42, %43 : vector<128x1xf32>
    %45 = math.rsqrt %44 : vector<128x1xf32>
    %46 = vector.broadcast %45 : vector<128x1xf32> to vector<128x128xf32>
    %47 = arith.mulf %37, %46 : vector<128x128xf32>
    %48 = vector.broadcast %18 : vector<1x128xf32> to vector<128x128xf32>
    %49 = arith.mulf %47, %48 : vector<128x128xf32>
    %50 = vector.broadcast %19 : vector<1x128xf32> to vector<128x128xf32>
    %51 = arith.addf %49, %50 : vector<128x128xf32>
    %cst_18 = arith.constant 0.000000e+00 : f32
    %52 = vector.broadcast %cst_18 : f32 to vector<128x128xf32>
    %53 = arith.maximumf %51, %52 : vector<128x128xf32>
    %c128_i32 = arith.constant 128 : i32
    %54 = arith.muli %arg1, %c128_i32 : i32
    %55 = tpu.assume_multiple %54, 128 : i32
    %56 = arith.index_cast %55 : i32 to index
    %c0_19 = arith.constant 0 : index
    %57 = vector.load %arg11[%56, %c0_19] : memref<128x128xf32, #tpu.memory_space<vmem>>, vector<128x128xf32>
    %58 = arith.addf %57, %53 : vector<128x128xf32>
    %59 = arith.index_cast %55 : i32 to index
    %c0_20 = arith.constant 0 : index
    %60 = vector.load %arg11[%59, %c0_20] : memref<128x128xf32, #tpu.memory_space<vmem>>, vector<128x128xf32>
    tpu.vector_store %arg11[%59, %c0_20], %58 {strides = array<i32>} : memref<128x128xf32, #tpu.memory_space<vmem>>, vector<128x128xf32>,
    %c1_i32_21 = arith.constant 1 : i32
    %61 = arith.cmpi eq, %arg0, %c1_i32_21 : i32
    %62 = arith.extui %61 : i1 to i32
    %c0_i32_22 = arith.constant 0 : i32
    %63 = arith.cmpi ne, %62, %c0_i32_22 : i32
    scf.if %63 {
      %c0_26 = arith.constant 0 : index
      %c0_27 = arith.constant 0 : index
      %69 = vector.load %arg9[%c0_26, %c0_27] : memref<128x128xf32, #tpu.memory_space<vmem>>, vector<128x128xf32>
      tpu.vector_store %arg9[%c0_26, %c0_27], %53 {strides = array<i32>} : memref<128x128xf32, #tpu.memory_space<vmem>>, vector<128x128xf32>,
      %c0_28 = arith.constant 0 : index
      %c0_29 = arith.constant 0 : index
      %70 = vector.load %arg13[%c0_28, %c0_29] : memref<16x128xf32, #tpu.memory_space<vmem>>, vector<16x128xf32>
      %c0_30 = arith.constant 0 : index
      %c0_31 = arith.constant 0 : index
      %71 = vector.load %arg3[%c0_30, %c0_31] : memref<16x128xbf16, #tpu.memory_space<vmem>>, vector<16x128xbf16>
      %72 = arith.truncf %53 : vector<128x128xf32> to vector<128x128xbf16>
      %cst_32 = arith.constant dense<0.000000e+00> : vector<16x128xf32>
      %73 = tpu.matmul %71, %72, %cst_32 {dimension_numbers = #tpu.dot_dimension_numbers<[1], [0], [0], [1], [0, 0, 1, 1], [], []>} : vector<16x128xbf16>, vector<128x128xbf16>, vector<16x128xf32> -> vector<16x128xf32>
      %74 = arith.addf %70, %73 : vector<16x128xf32>
      %c0_33 = arith.constant 0 : index
      %c0_34 = arith.constant 0 : index
      %75 = vector.load %arg13[%c0_33, %c0_34] : memref<16x128xf32, #tpu.memory_space<vmem>>, vector<16x128xf32>
      tpu.vector_store %arg13[%c0_33, %c0_34], %74 {strides = array<i32>} : memref<16x128xf32, #tpu.memory_space<vmem>>, vector<16x128xf32>,
    } else {
    }
    %c1_i32_23 = arith.constant 1 : i32
    %64 = arith.cmpi eq, %arg0, %c1_i32_23 : i32
    %c0_i32_24 = arith.constant 0 : i32
    %65 = arith.cmpi eq, %arg1, %c0_i32_24 : i32
    %66 = arith.andi %64, %65 : i1
    %67 = arith.extui %66 : i1 to i32
    %c0_i32_25 = arith.constant 0 : i32
    %68 = arith.cmpi ne, %67, %c0_i32_25 : i32
    scf.if %68 {
      %c0_26 = arith.constant 0 : index
      %c0_27 = arith.constant 0 : index
      %69 = vector.load %arg13[%c0_26, %c0_27] : memref<16x128xf32, #tpu.memory_space<vmem>>, vector<16x128xf32>
      %c0_28 = arith.constant 0 : index
      %c0_29 = arith.constant 0 : index
      %70 = vector.load %arg10[%c0_28, %c0_29] : memref<16x128xf32, #tpu.memory_space<vmem>>, vector<16x128xf32>
      tpu.vector_store %arg10[%c0_28, %c0_29], %69 {strides = array<i32>} : memref<16x128xf32, #tpu.memory_space<vmem>>, vector<16x128xf32>,
    } else {
    }
    return
  }
  func.func @transform_0(%arg0: i32, %arg1: i32) -> (i32, i32) {
    %c0_i32 = arith.constant 0 : i32
    %c0_i32_0 = arith.constant 0 : i32
    return %arg1, %c0_i32 : i32, i32
  }
  func.func @transform_1(%arg0: i32, %arg1: i32) -> (i32, i32) {
    %c0_i32 = arith.constant 0 : i32
    %c0_i32_0 = arith.constant 0 : i32
    return %c0_i32, %arg1 : i32, i32
  }
  func.func @transform_2(%arg0: i32, %arg1: i32) -> (i32, i32) {
    %c0_i32 = arith.constant 0 : i32
    %c0_i32_0 = arith.constant 0 : i32
    %c0_i32_1 = arith.constant 0 : i32
    return %c0_i32, %c0_i32_0 : i32, i32
  }
  func.func @transform_3(%arg0: i32, %arg1: i32) -> (i32, i32) {
    %c0_i32 = arith.constant 0 : i32
    %c0_i32_0 = arith.constant 0 : i32
    %c0_i32_1 = arith.constant 0 : i32
    return %c0_i32, %c0_i32_0 : i32, i32
  }
  func.func @transform_4(%arg0: i32, %arg1: i32) -> (i32, i32, i32) {
    %c0_i32 = arith.constant 0 : i32
    %c0_i32_0 = arith.constant 0 : i32
    %c0_i32_1 = arith.constant 0 : i32
    return %arg0, %c0_i32, %c0_i32_0 : i32, i32, i32
  }
  func.func @transform_5(%arg0: i32, %arg1: i32) -> (i32, i32, i32) {
    %c0_i32 = arith.constant 0 : i32
    %c0_i32_0 = arith.constant 0 : i32
    %c0_i32_1 = arith.constant 0 : i32
    return %arg0, %c0_i32, %c0_i32_0 : i32, i32, i32
  }
  func.func @transform_6(%arg0: i32, %arg1: i32) -> (i32, i32) {
    %c0_i32 = arith.constant 0 : i32
    %c0_i32_0 = arith.constant 0 : i32
    %c0_i32_1 = arith.constant 0 : i32
    return %c0_i32, %c0_i32_0 : i32, i32
  }
  func.func @transform_7(%arg0: i32, %arg1: i32) -> (i32, i32) {
    %c0_i32 = arith.constant 0 : i32
    %c0_i32_0 = arith.constant 0 : i32
    return %arg1, %c0_i32 : i32, i32
  }
  func.func @transform_8(%arg0: i32, %arg1: i32) -> (i32, i32) {
    %c0_i32 = arith.constant 0 : i32
    %c0_i32_0 = arith.constant 0 : i32
    %c0_i32_1 = arith.constant 0 : i32
    return %c0_i32, %c0_i32_0 : i32, i32
  }
}

</mosaic_0001>

<bundles_post_ra>
// kernel: bgrl_forward.1
= control target key start
LH: loop header
LB: loop body
LE: loop exit
PB: predicated region body
PF: predicated region fallthrough
CT: control target
= control target key end

     0   :  { %s2019_s27 = smov 0   ;;  %s2021_s28 = smov 0   ;;  %s2515_s0 = inlined_call_operand.vmem [shape: bf16[128,128], index: 0, kind: input, shape index: {}]   ;;  %s2516_s1 = inlined_call_operand.vmem [shape: bf16[16,128], index: 1, kind: input, shape index: {}]   ;;  %s2517_s2 = inlined_call_operand.vmem [shape: bf16[128,128], index: 2, kind: input, shape index: {}]   ;;  %s2518_s3 = inlined_call_operand.vmem [shape: bf16[128,256], index: 3, kind: input, shape index: {}]   ;;  %s2519_s4 = inlined_call_operand.vmem [shape: bf16[2,128,128], index: 4, kind: input, shape index: {}]   ;;  %s2520_s5 = inlined_call_operand.vmem [shape: f32[2,3,128], index: 5, kind: input, shape index: {}]   ;;  %s2521_s6 = inlined_call_operand.vmem [shape: f32[1,128], index: 6, kind: input, shape index: {}]   ;;  %s2522_s7 = inlined_call_operand.vmem [shape: f32[128,128], index: 7, kind: output, shape index: {0}]   ;;  %s2523_s8 = inlined_call_operand.vmem [shape: f32[16,128], index: 8, kind: output, shape index: {1}]  }
   0x1   :  { %s2023_s29 = smov 0  }
   0x2 LB: > { %s31_s30 = sadd.s32 1, %s1963_s28  ;;  %p1603_p0 = scmp.ge.s32.totalorder %s1967_s29, 1  ;;  %s1967_s29 = sphi %s2023_s29, %s19_s29   ;;  %s1963_s28 = sphi %s2021_s28, %s2525_s28   ;;  %s1959_s27 = sphi %s2019_s27, %s2524_s27  }
   0x3   : > { %p33_p1 = scmp.ge.s32.totalorder %s31_s30, 2  ;;  %p301_p2 = scmp.lt.s32.totalorder %s1967_s29, 3 }
   0x5   : > { %s2527_s30 = smov (%p33_p1, %s31_s30), 0  ;;  %p302_p3 = pnand %p1603_p0, %p301_p2 }
   0x6   : > { %p358_p4 = scmp.lt.s32.totalorder (!%p302_p3), %s1959_s27, 1  ;;  %p375_p5 = scmp.eq.s32.totalorder (!%p302_p3), %s1959_s27, 0 }
   0x7   : > { %305 = sbr.rel (%p302_p3) target bundleno = 1407 (0x57f), region = 48 }
   0xe   : > { %s359_s9 = scalar_select %p358_p4, %s1959_s27, 1 }
   0xf   : > { %379 = sbr.rel (!%p375_p5) target bundleno = 291 (0x123), region = 52  ;;  %v1864_v0 = vld [vmem:[%s2518_s3 + $0x4] ss:$8 sps:$4 sm:$0xff] (%p375_p5)   ;;  %v1866_v1 = vld [vmem:[%s2518_s3] ss:$8 sps:$4 sm:$0xff] (%p375_p5)   ;;  %v1969_v2 = vmov (%p375_p5), 0  }
  0x10   : > { %s1658_s10 = sshll.u32 %s359_s9, 6  ;;  %s1606_s11 = sshll.u32 %s359_s9, 2  ;;  %572 = vmatprep.mubr.bf16.mxu0 (%p375_p5), %v1969_v2  ;;  %612 = vmatprep.mubr.bf16.mxu1 (%p375_p5), %v1969_v2  ;;  %v1867_v3 = vld [vmem:[%s2518_s3 + $0x14] ss:$8 sps:$4 sm:$0xff] (%p375_p5)   ;;  %v1869_v4 = vld [vmem:[%s2518_s3 + $0x10] ss:$8 sps:$4 sm:$0xff] (%p375_p5)  }
  0x11   : > { %s2045_s14 = scalar_lea.vmem %s2519_s4, %s1658_s10  ;;  %s2050_s17 = scalar_lea.vmem %s2520_s5, %s1606_s11  ;;  %540 = vmatprep.subr.bf16.mxu0 (%p375_p5), %v1864_v0  ;;  %1787 = vmatprep.subr.bf16.mxu1 (%p375_p5), %v1864_v0  ;;  %v1870_v5 = vld [vmem:[%s2518_s3 + $0x24] ss:$8 sps:$4 sm:$0xff] (%p375_p5)   ;;  %v1872_v6 = vld [vmem:[%s2518_s3 + $0x20] ss:$8 sps:$4 sm:$0xff] (%p375_p5)   ;;  %v1873_v7 = vld [vmem:[%s2518_s3 + $0x34] ss:$8 sps:$4 sm:$0xff] (%p375_p5)  }
  0x12   : > { %541 = vmatpush1.bf16.msra.mxu0 (%p375_p5), %v1866_v1  ;;  %1795 = vmatpush1.bf16.msra.mxu1 (%p375_p5), %v1866_v1  ;;  %v1875_v8 = vld [vmem:[%s2518_s3 + $0x30] ss:$8 sps:$4 sm:$0xff] (%p375_p5)   ;;  %v1876_v9 = vld [vmem:[%s2518_s3 + $0x44] ss:$8 sps:$4 sm:$0xff] (%p375_p5)   ;;  %v1878_v10 = vld [vmem:[%s2518_s3 + $0x40] ss:$8 sps:$4 sm:$0xff] (%p375_p5)  }
  0x13   : > { %542 = vmatprep.subr.bf16.mxu0 (%p375_p5), %v1867_v3  ;;  %1788 = vmatprep.subr.bf16.mxu1 (%p375_p5), %v1867_v3  ;;  %v1879_v11 = vld [vmem:[%s2518_s3 + $0x54] ss:$8 sps:$4 sm:$0xff] (%p375_p5)   ;;  %v1881_v12 = vld [vmem:[%s2518_s3 + $0x50] ss:$8 sps:$4 sm:$0xff] (%p375_p5)   ;;  %v1882_v13 = vld [vmem:[%s2518_s3 + $0x64] ss:$8 sps:$4 sm:$0xff] (%p375_p5)  }
  0x14   : > { %v1884_v14 = vld [vmem:[%s2518_s3 + $0x60] ss:$8 sps:$4 sm:$0xff] (%p375_p5)   ;;  %v1885_v15 = vld [vmem:[%s2518_s3 + $0x74] ss:$8 sps:$4 sm:$0xff] (%p375_p5)   ;;  %v1887_v16 = vld [vmem:[%s2518_s3 + $0x70] ss:$8 sps:$4 sm:$0xff] (%p375_p5)  }
  0x15   : > { %v1888_v17 = vld [vmem:[%s2517_s2] sm:$0xff] (%p375_p5)   ;;  %v1890_v19 = vld [vmem:[%s2517_s2 + $0x8] sm:$0xff] (%p375_p5)   ;;  %v1892_v21 = vld [vmem:[%s2517_s2 + $0x10] sm:$0xff] (%p375_p5)  }
  0x16   : > { %543 = vmatpush1.bf16.msra.mxu0 %v1869_v4  ;;  %1796 = vmatpush1.bf16.msra.mxu1 %v1869_v4  ;;  %v1889_v18 = vld [vmem:[%s2517_s2 + $0x20] sm:$0xff]   ;;  %v1891_v20 = vld [vmem:[%s2517_s2 + $0x28] sm:$0xff]   ;;  %v1893_v22 = vld [vmem:[%s2517_s2 + $0x30] sm:$0xff]  }
  0x17   : > { %544 = vmatprep.subr.bf16.mxu0 %v1870_v5  ;;  %1789 = vmatprep.subr.bf16.mxu1 %v1870_v5  ;;  %v1894_v23 = vld [vmem:[%s2517_s2 + $0x18] sm:$0xff]   ;;  %v2135_v25 = vld [vmem:[%s2521_s6] ss:$0 sm:$0xff] }
  0x18   : > { %v1895_v24 = vld [vmem:[%s2517_s2 + $0x38] sm:$0xff]  }
  0x1a   : > { %545 = vmatpush1.bf16.msra.mxu0 %v1872_v6  ;;  %1797 = vmatpush1.bf16.msra.mxu1 %v1872_v6 }
  0x1b   : > { %546 = vmatprep.subr.bf16.mxu0 %v1873_v7  ;;  %1790 = vmatprep.subr.bf16.mxu1 %v1873_v7 }
  0x1e   : > { %547 = vmatpush1.bf16.msra.mxu0 %v1875_v8  ;;  %1798 = vmatpush1.bf16.msra.mxu1 %v1875_v8 }
  0x1f   : > { %548 = vmatprep.subr.bf16.mxu0 %v1876_v9  ;;  %1791 = vmatprep.subr.bf16.mxu1 %v1876_v9 }
  0x22   : > { %549 = vmatpush1.bf16.msra.mxu0 %v1878_v10  ;;  %1799 = vmatpush1.bf16.msra.mxu1 %v1878_v10 }
  0x23   : > { %550 = vmatprep.subr.bf16.mxu0 %v1879_v11  ;;  %1792 = vmatprep.subr.bf16.mxu1 %v1879_v11 }
  0x26   : > { %551 = vmatpush1.bf16.msra.mxu0 %v1881_v12  ;;  %1800 = vmatpush1.bf16.msra.mxu1 %v1881_v12 }
  0x27   : > { %552 = vmatprep.subr.bf16.mxu0 %v1882_v13  ;;  %1793 = vmatprep.subr.bf16.mxu1 %v1882_v13 }
  0x2a   : > { %553 = vmatpush1.bf16.msra.mxu0 %v1884_v14  ;;  %1801 = vmatpush1.bf16.msra.mxu1 %v1884_v14 }
  0x2b   : > { %554 = vmatprep.subr.bf16.mxu0 %v1885_v15  ;;  %1794 = vmatprep.subr.bf16.mxu1 %v1885_v15 }
  0x2e   : > { %555 = vmatpush1.bf16.msra.mxu0 %v1887_v16  ;;  %1802 = vmatpush1.bf16.msra.mxu1 %v1887_v16 }
  0x31   : > { %573 = vmatmul.mubr.bf16.vlgmr.msra.gmra.mrb[0].mxu0 %v1888_v17  ;;  %613 = vmatmul.mubr.bf16.vlgmr.msra.gmra.mrb[0].mxu1 %v1889_v18 }
  0x32   : > { %582 = vmatprep.mubr.bf16.mxu0 %v1969_v2  ;;  %622 = vmatprep.mubr.bf16.mxu1 %v1969_v2 }
  0x39   : > { %583 = vmatmul.mubr.bf16.gmra.mrb[4].mxu0 %v1890_v19  ;;  %623 = vmatmul.mubr.bf16.gmra.mrb[4].mxu1 %v1891_v20 }
  0x3a   : > { %592 = vmatprep.mubr.bf16.mxu0 %v1969_v2  ;;  %632 = vmatprep.mubr.bf16.mxu1 %v1969_v2 }
  0x41   : > { %593 = vmatmul.mubr.bf16.gmra.mrb[8].mxu0 %v1892_v21  ;;  %633 = vmatmul.mubr.bf16.gmra.mrb[8].mxu1 %v1893_v22 }
  0x42   : > { %602 = vmatprep.mubr.bf16.mxu0 %v1969_v2  ;;  %642 = vmatprep.mubr.bf16.mxu1 %v1969_v2 }
  0x49   : > { %603 = vmatmul.mubr.bf16.gmra.mrb[12].mxu0 %v1894_v23  ;;  %643 = vmatmul.mubr.bf16.gmra.mrb[12].mxu1 %v1895_v24 }
 0x104   : > { %v574_v26 = vpop.f32.mrb[0].mxu0  ;;  %v614_v27 = vpop.f32.mrb[0].mxu1 }
 0x105   : > { %v576_v28 = vpop.f32.mrb[1].mxu0  ;;  %v616_v29 = vpop.f32.mrb[1].mxu1 }
 0x106   : > { %v676_v30 = vadd.f32 %v2135_v25, %v576_v28  ;;  %v684_v31 = vadd.f32 %v2135_v25, %v616_v29  ;;  %v578_v32 = vpop.f32.mrb[2].mxu0  ;;  %v618_v33 = vpop.f32.mrb[2].mxu1 }
 0x107   : > { %v653_v34 = vpack.c.bf16 %v578_v32, %v574_v26  ;;  %v657_v35 = vpack.c.bf16 %v618_v33, %v614_v27  ;;  %v580_v36 = vpop.f32.mrb[3].mxu0  ;;  %v620_v37 = vpop.f32.mrb[3].mxu1 }
 0x108   : > { %692 = vst [vmem:[#allocation2] sm:$0xff] %v676_v30  ;;  %700 = vst [vmem:[#allocation2 + $0x40] sm:$0xff] %v684_v31  ;;  %v677_v38 = vadd.f32 %v2135_v25, %v580_v36  ;;  %v685_v39 = vadd.f32 %v2135_v25, %v620_v37 }
 0x109   : > { %661 = vst [vmem:[#allocation3] sm:$0xff] %v653_v34  ;;  %665 = vst [vmem:[#allocation3 + $0x20] sm:$0xff] %v657_v35 }
 0x10a   : > { %693 = vst [vmem:[#allocation2 + $0x8] sm:$0xff] %v677_v38  ;;  %701 = vst [vmem:[#allocation2 + $0x48] sm:$0xff] %v685_v39 }
 0x10c   : > { %v584_v40 = vpop.f32.mrb[4].mxu0  ;;  %v624_v41 = vpop.f32.mrb[4].mxu1 }
 0x10d   : > { %v586_v42 = vpop.f32.mrb[5].mxu0  ;;  %v626_v43 = vpop.f32.mrb[5].mxu1 }
 0x10e   : > { %v678_v44 = vadd.f32 %v2135_v25, %v586_v42  ;;  %v686_v45 = vadd.f32 %v2135_v25, %v626_v43  ;;  %v588_v46 = vpop.f32.mrb[6].mxu0  ;;  %v628_v47 = vpop.f32.mrb[6].mxu1 }
 0x10f   : > { %v654_v48 = vpack.c.bf16 %v588_v46, %v584_v40  ;;  %v658_v49 = vpack.c.bf16 %v628_v47, %v624_v41  ;;  %v590_v50 = vpop.f32.mrb[7].mxu0  ;;  %v630_v51 = vpop.f32.mrb[7].mxu1 }
 0x110   : > { %694 = vst [vmem:[#allocation2 + $0x10] sm:$0xff] %v678_v44  ;;  %702 = vst [vmem:[#allocation2 + $0x50] sm:$0xff] %v686_v45  ;;  %v679_v52 = vadd.f32 %v2135_v25, %v590_v50  ;;  %v687_v53 = vadd.f32 %v2135_v25, %v630_v51 }
 0x111   : > { %662 = vst [vmem:[#allocation3 + $0x8] sm:$0xff] %v654_v48  ;;  %666 = vst [vmem:[#allocation3 + $0x28] sm:$0xff] %v658_v49 }
 0x112   : > { %695 = vst [vmem:[#allocation2 + $0x18] sm:$0xff] %v679_v52  ;;  %703 = vst [vmem:[#allocation2 + $0x58] sm:$0xff] %v687_v53 }
 0x114   : > { %v594_v54 = vpop.f32.mrb[8].mxu0  ;;  %v634_v55 = vpop.f32.mrb[8].mxu1 }
 0x115   : > { %v596_v56 = vpop.f32.mrb[9].mxu0  ;;  %v636_v57 = vpop.f32.mrb[9].mxu1 }
 0x116   : > { %v680_v58 = vadd.f32 %v2135_v25, %v596_v56  ;;  %v688_v59 = vadd.f32 %v2135_v25, %v636_v57  ;;  %v598_v60 = vpop.f32.mrb[10].mxu0  ;;  %v638_v61 = vpop.f32.mrb[10].mxu1 }
 0x117   : > { %v655_v62 = vpack.c.bf16 %v598_v60, %v594_v54  ;;  %v659_v63 = vpack.c.bf16 %v638_v61, %v634_v55  ;;  %v600_v0 = vpop.f32.mrb[11].mxu0  ;;  %v640_v1 = vpop.f32.mrb[11].mxu1 }
 0x118   : > { %696 = vst [vmem:[#allocation2 + $0x20] sm:$0xff] %v680_v58  ;;  %704 = vst [vmem:[#allocation2 + $0x60] sm:$0xff] %v688_v59  ;;  %v681_v2 = vadd.f32 %v2135_v25, %v600_v0  ;;  %v689_v3 = vadd.f32 %v2135_v25, %v640_v1 }
 0x119   : > { %663 = vst [vmem:[#allocation3 + $0x10] sm:$0xff] %v655_v62  ;;  %667 = vst [vmem:[#allocation3 + $0x30] sm:$0xff] %v659_v63 }
 0x11a   : > { %697 = vst [vmem:[#allocation2 + $0x28] sm:$0xff] %v681_v2  ;;  %705 = vst [vmem:[#allocation2 + $0x68] sm:$0xff] %v689_v3 }
 0x11c   : > { %v604_v4 = vpop.f32.mrb[12].mxu0  ;;  %v644_v5 = vpop.f32.mrb[12].mxu1 }
 0x11d   : > { %v606_v6 = vpop.f32.mrb[13].mxu0  ;;  %v646_v7 = vpop.f32.mrb[13].mxu1 }
 0x11e   : > { %v682_v8 = vadd.f32 %v2135_v25, %v606_v6  ;;  %v690_v9 = vadd.f32 %v2135_v25, %v646_v7  ;;  %v608_v10 = vpop.f32.mrb[14].mxu0  ;;  %v648_v11 = vpop.f32.mrb[14].mxu1 }
 0x11f   : > { %v656_v12 = vpack.c.bf16 %v608_v10, %v604_v4  ;;  %v660_v13 = vpack.c.bf16 %v648_v11, %v644_v5  ;;  %v610_v14 = vpop.f32.mrb[15].mxu0  ;;  %v650_v15 = vpop.f32.mrb[15].mxu1 }
 0x120   : > { %698 = vst [vmem:[#allocation2 + $0x30] sm:$0xff] %v682_v8  ;;  %706 = vst [vmem:[#allocation2 + $0x70] sm:$0xff] %v690_v9  ;;  %v683_v16 = vadd.f32 %v2135_v25, %v610_v14  ;;  %v691_v17 = vadd.f32 %v2135_v25, %v650_v15 }
 0x121   : > { %664 = vst [vmem:[#allocation3 + $0x18] sm:$0xff] %v656_v12  ;;  %668 = vst [vmem:[#allocation3 + $0x38] sm:$0xff] %v660_v13 }
 0x122   : > { %699 = vst [vmem:[#allocation2 + $0x38] sm:$0xff] %v683_v16  ;;  %707 = vst [vmem:[#allocation2 + $0x78] sm:$0xff] %v691_v17 }
 0x123 PF: > { %p708_p6 = scmp.gt.s32.totalorder %s1959_s27, 0 }
 0x124   : > { %v1896_v18 = vld [vmem:[%s2045_s14] sm:$0xff] (%p708_p6)   ;;  %v1897_v19 = vld [vmem:[%s2045_s14 + $0x8] sm:$0xff] (%p708_p6)   ;;  %v1898_v20 = vld [vmem:[%s2045_s14 + $0x10] sm:$0xff] (%p708_p6)  }
 0x125   : > { %712 = sbr.rel (!%p708_p6) target bundleno = 551 (0x227), region = 56  ;;  %1703 = vmatprep.subr.bf16.mxu0 (%p708_p6), %v1896_v18  ;;  %1803 = vmatprep.subr.bf16.mxu1 (%p708_p6), %v1896_v18  ;;  %v1899_v21 = vld [vmem:[%s2045_s14 + $0x18] sm:$0xff] (%p708_p6)   ;;  %v714_v23 = vld [vmem:[#allocation2 + $0x8] sm:$0xff] (%p708_p6)  ;;  %v1901_v29 = vld [vmem:[%s2045_s14 + $0x28] sm:$0xff] (%p708_p6)  }
 0x126   : > { %1704 = vmatpush3.bf16.msra.mxu0 (%p708_p6), %v1896_v18  ;;  %1811 = vmatpush3.bf16.msra.mxu1 (%p708_p6), %v1896_v18  ;;  %v713_v22 = vld [vmem:[#allocation2] sm:$0xff] (%p708_p6)  ;;  %v722_v26 = vld [vmem:[#allocation2 + $0x48] sm:$0xff] (%p708_p6)  ;;  %v1902_v30 = vld [vmem:[%s2045_s14 + $0x30] sm:$0xff] (%p708_p6)  }
 0x127   : > { %1705 = vmatprep.subr.bf16.mxu0 (%p708_p6), %v1897_v19  ;;  %1804 = vmatprep.subr.bf16.mxu1 (%p708_p6), %v1897_v19  ;;  %v721_v24 = vld [vmem:[#allocation2 + $0x40] sm:$0xff] (%p708_p6)  ;;  %v729_v25 = vpack.c.bf16 (%p708_p6), %v714_v23, %v713_v22  ;;  %v1900_v28 = vld [vmem:[%s2045_s14 + $0x20] sm:$0xff] (%p708_p6)   ;;  %v715_v32 = vld [vmem:[#allocation2 + $0x10] sm:$0xff] (%p708_p6) }
 0x128   : > { %v733_v27 = vpack.c.bf16 (%p708_p6), %v722_v26, %v721_v24  ;;  %v1903_v31 = vld [vmem:[%s2045_s14 + $0x38] sm:$0xff] (%p708_p6)   ;;  %v716_v33 = vld [vmem:[#allocation2 + $0x18] sm:$0xff] (%p708_p6)  ;;  %v723_v34 = vld [vmem:[#allocation2 + $0x50] sm:$0xff] (%p708_p6) }
 0x129   : > { %1719 = vmatprep.mubr.bf16.mxu0 (%p708_p6), %v729_v25  ;;  %v724_v35 = vld [vmem:[#allocation2 + $0x58] sm:$0xff] (%p708_p6)  ;;  %v717_v36 = vld [vmem:[#allocation2 + $0x20] sm:$0xff] (%p708_p6)  ;;  %v718_v37 = vld [vmem:[#allocation2 + $0x28] sm:$0xff] (%p708_p6)  ;;  %v730_v40 = vpack.c.bf16 (%p708_p6), %v716_v33, %v715_v32 }
 0x12a   : > { %1706 = vmatpush3.bf16.msra.mxu0 (%p708_p6), %v1897_v19  ;;  %1812 = vmatpush3.bf16.msra.mxu1 (%p708_p6), %v1897_v19  ;;  %v725_v38 = vld [vmem:[#allocation2 + $0x60] sm:$0xff] (%p708_p6)  ;;  %v726_v39 = vld [vmem:[#allocation2 + $0x68] sm:$0xff] (%p708_p6)  ;;  %v734_v41 = vpack.c.bf16 (%p708_p6), %v724_v35, %v723_v34  ;;  %v731_v42 = vpack.c.bf16 (%p708_p6), %v718_v37, %v717_v36  ;;  %v719_v44 = vld [vmem:[#allocation2 + $0x30] sm:$0xff] (%p708_p6) }
 0x12b   : > { %1707 = vmatprep.subr.bf16.mxu0 (%p708_p6), %v1898_v20  ;;  %1805 = vmatprep.subr.bf16.mxu1 (%p708_p6), %v1898_v20  ;;  %v735_v43 = vpack.c.bf16 (%p708_p6), %v726_v39, %v725_v38  ;;  %v720_v45 = vld [vmem:[#allocation2 + $0x38] sm:$0xff] (%p708_p6)  ;;  %v727_v46 = vld [vmem:[#allocation2 + $0x70] sm:$0xff] (%p708_p6) }
 0x12c   : > { %1727 = vmatprep.mubr.bf16.mxu1 %v733_v27  ;;  %v728_v47 = vld [vmem:[#allocation2 + $0x78] sm:$0xff]  ;;  %v732_v48 = vpack.c.bf16 %v720_v45, %v719_v44 }
 0x12d   : > { %v736_v49 = vpack.c.bf16 %v728_v47, %v727_v46 }
 0x12e   : > { %1708 = vmatpush3.bf16.msra.mxu0 %v1898_v20  ;;  %1813 = vmatpush3.bf16.msra.mxu1 %v1898_v20 }
 0x12f   : > { %1709 = vmatprep.subr.bf16.mxu0 %v1899_v21  ;;  %1806 = vmatprep.subr.bf16.mxu1 %v1899_v21 }
 0x132   : > { %1710 = vmatpush3.bf16.msra.mxu0 %v1899_v21  ;;  %1814 = vmatpush3.bf16.msra.mxu1 %v1899_v21 }
 0x133   : > { %1711 = vmatprep.subr.bf16.mxu0 %v1900_v28  ;;  %1807 = vmatprep.subr.bf16.mxu1 %v1900_v28 }
 0x136   : > { %1712 = vmatpush3.bf16.msra.mxu0 %v1900_v28  ;;  %1815 = vmatpush3.bf16.msra.mxu1 %v1900_v28 }
 0x137   : > { %1713 = vmatprep.subr.bf16.mxu0 %v1901_v29  ;;  %1808 = vmatprep.subr.bf16.mxu1 %v1901_v29 }
 0x13a   : > { %1714 = vmatpush3.bf16.msra.mxu0 %v1901_v29  ;;  %1816 = vmatpush3.bf16.msra.mxu1 %v1901_v29 }
 0x13b   : > { %1715 = vmatprep.subr.bf16.mxu0 %v1902_v30  ;;  %1809 = vmatprep.subr.bf16.mxu1 %v1902_v30 }
 0x13e   : > { %1716 = vmatpush3.bf16.msra.mxu0 %v1902_v30  ;;  %1817 = vmatpush3.bf16.msra.mxu1 %v1902_v30 }
 0x13f   : > { %1717 = vmatprep.subr.bf16.mxu0 %v1903_v31  ;;  %1810 = vmatprep.subr.bf16.mxu1 %v1903_v31 }
 0x142   : > { %1718 = vmatpush3.bf16.msra.mxu0 %v1903_v31  ;;  %1818 = vmatpush3.bf16.msra.mxu1 %v1903_v31 }
 0x145   : > { %1720 = vmatmul.mubr.bf16.vlgmr.msra.gmra.mrb[0].mxu0 %v730_v40  ;;  %1728 = vmatmul.mubr.bf16.vlgmr.msra.gmra.mrb[0].mxu1 %v734_v41 }
 0x146   : > { %1723 = vmatprep.mubr.bf16.mxu0 %v731_v42  ;;  %1731 = vmatprep.mubr.bf16.mxu1 %v735_v43 }
 0x14d   : > { %1724 = vmatmul.mubr.bf16.gmra.mrb[4].mxu0 %v732_v48  ;;  %1732 = vmatmul.mubr.bf16.gmra.mrb[4].mxu1 %v736_v49 }
 0x218   : > { %v1721_v50 = vpop.f32.mrb[0].mxu0  ;;  %v1729_v51 = vpop.f32.mrb[0].mxu1 }
 0x219   : > { %v835_v52 = vpop.f32.mrb[1].mxu0  ;;  %v867_v53 = vpop.f32.mrb[1].mxu1 }
 0x21a   : > { %v1722_v54 = vpop.f32.mrb[2].mxu0  ;;  %v1730_v55 = vpop.f32.mrb[2].mxu1 }
 0x21b   : > { %v899_v56 = vpack.c.bf16 %v1722_v54, %v1721_v50  ;;  %v903_v57 = vpack.c.bf16 %v1730_v55, %v1729_v51  ;;  %v838_v58 = vpop.f32.mrb[3].mxu0  ;;  %v870_v59 = vpop.f32.mrb[3].mxu1 }
 0x21c   : > { %v898_v60 = vpack.c.bf16 %v838_v58, %v835_v52  ;;  %v902_v61 = vpack.c.bf16 %v870_v59, %v867_v53 }
 0x21d   : > { %907 = vst [vmem:[#allocation3 + $0x8] sm:$0xff] %v899_v56  ;;  %911 = vst [vmem:[#allocation3 + $0x28] sm:$0xff] %v903_v57 }
 0x21e   : > { %906 = vst [vmem:[#allocation3] sm:$0xff] %v898_v60  ;;  %910 = vst [vmem:[#allocation3 + $0x20] sm:$0xff] %v902_v61 }
 0x220   : > { %v1725_v62 = vpop.f32.mrb[4].mxu0  ;;  %v1733_v63 = vpop.f32.mrb[4].mxu1 }
 0x221   : > { %v851_v0 = vpop.f32.mrb[5].mxu0  ;;  %v883_v1 = vpop.f32.mrb[5].mxu1 }
 0x222   : > { %v1726_v2 = vpop.f32.mrb[6].mxu0  ;;  %v1734_v3 = vpop.f32.mrb[6].mxu1 }
 0x223   : > { %v901_v4 = vpack.c.bf16 %v1726_v2, %v1725_v62  ;;  %v905_v5 = vpack.c.bf16 %v1734_v3, %v1733_v63  ;;  %v854_v6 = vpop.f32.mrb[7].mxu0  ;;  %v886_v7 = vpop.f32.mrb[7].mxu1 }
 0x224   : > { %v900_v8 = vpack.c.bf16 %v854_v6, %v851_v0  ;;  %v904_v9 = vpack.c.bf16 %v886_v7, %v883_v1 }
 0x225   : > { %909 = vst [vmem:[#allocation3 + $0x18] sm:$0xff] %v901_v4  ;;  %913 = vst [vmem:[#allocation3 + $0x38] sm:$0xff] %v905_v5 }
 0x226   : > { %908 = vst [vmem:[#allocation3 + $0x10] sm:$0xff] %v900_v8  ;;  %912 = vst [vmem:[#allocation3 + $0x30] sm:$0xff] %v904_v9 }
 0x227 PF: > { %p914_p7 = scmp.eq.s32.totalorder %s1959_s27, 1 }
 0x228   : > { %v1970_v10 = vmov (%p914_p7), 0.0  }
 0x229   : > { %918 = sbr.rel (!%p914_p7) target bundleno = 560 (0x230), region = 60  ;;  %919 = vst [vmem:[#allocation4] sm:$0xff] (%p914_p7), %v1970_v10  ;;  %920 = vst [vmem:[#allocation4 + $0x8] sm:$0xff] (%p914_p7), %v1970_v10 }
 0x230 PF: > { %v938_v11 = vld [vmem:[#allocation3] sm:$0xff]  ;;  %v939_v12 = vld [vmem:[#allocation3 + $0x8] sm:$0xff]  ;;  %v940_v13 = vld [vmem:[#allocation3 + $0x10] sm:$0xff]  ;;  %v946_v27 = vlaneseq  ;;  %v1971_v5 = vmov 0.0   ;;  %p1652_p8 = scmp.ne.s32.totalorder %s1959_s27, 1 }
 0x231   : > { %1735 = vmatprep.subr.bf16.mxu0 %v938_v11  ;;  %1819 = vmatprep.subr.bf16.mxu1 %v938_v11  ;;  %v1904_v14 = vld [vmem:[%s2515_s0] sm:$0xff]   ;;  %v941_v16 = vld [vmem:[#allocation3 + $0x18] sm:$0xff]  ;;  %v942_v17 = vld [vmem:[#allocation3 + $0x20] sm:$0xff]  ;;  %vm1973_vm1 = vmmov (!%p1652_p8), 0  }
 0x232   : > { %1736 = vmatpush3.bf16.msra.mxu0 %v938_v11  ;;  %1827 = vmatpush3.bf16.msra.mxu1 %v938_v11  ;;  %v1905_v15 = vld [vmem:[%s2515_s0 + $0x20] sm:$0xff]   ;;  %v944_v19 = vld [vmem:[#allocation3 + $0x30] sm:$0xff]  ;;  %v945_v20 = vld [vmem:[#allocation3 + $0x38] sm:$0xff]  ;;  %v2189_v28 = vshrl.u32 %v946_v27, 7  ;;  %v1096_v0 = vand.u32 127, %v946_v27 }
 0x233   : > { %1737 = vmatprep.subr.bf16.mxu0 %v939_v12  ;;  %1820 = vmatprep.subr.bf16.mxu1 %v939_v12  ;;  %v943_v18 = vld [vmem:[#allocation3 + $0x28] sm:$0xff]  ;;  %v1906_v21 = vld [vmem:[%s2515_s0 + $0x8] sm:$0xff]   ;;  %v1908_v23 = vld [vmem:[%s2515_s0 + $0x10] sm:$0xff]  }
 0x234   : > { %1751 = vmatprep.mubr.bf16.mxu0 %v1904_v14  ;;  %1759 = vmatprep.mubr.bf16.mxu1 %v1905_v15  ;;  %v1907_v22 = vld [vmem:[%s2515_s0 + $0x28] sm:$0xff]   ;;  %v1910_v24 = vld [vmem:[%s2515_s0 + $0x30] sm:$0xff]   ;;  %v1909_v25 = vld [vmem:[%s2515_s0 + $0x18] sm:$0xff]   ;;  %v948_v29 = vsub.s32 0, %v2189_v28  ;;  %vm1097_vm0 = vcmp.lt.s32.totalorder %v1096_v0, 32 }
 0x235   : > { %v1911_v26 = vld [vmem:[%s2515_s0 + $0x38] sm:$0xff]   ;;  %v2193_v30 = vld [vmem:[%s2050_s17] sm:$0x7]  ;;  %v2235_v6 = vsel %vm1097_vm0, 1.0, %v1971_v5 }
 0x236   : > { %1738 = vmatpush3.bf16.msra.mxu0 %v939_v12  ;;  %1828 = vmatpush3.bf16.msra.mxu1 %v939_v12  ;;  %v949_v31 = vrot.slane %v2193_v30, %v948_v29 }
 0x237   : > { %1739 = vmatprep.subr.bf16.mxu0 %v940_v13  ;;  %1821 = vmatprep.subr.bf16.mxu1 %v940_v13 }
 0x23a   : > { %1740 = vmatpush3.bf16.msra.mxu0 %v940_v13  ;;  %1829 = vmatpush3.bf16.msra.mxu1 %v940_v13 }
 0x23b   : > { %1741 = vmatprep.subr.bf16.mxu0 %v941_v16  ;;  %1822 = vmatprep.subr.bf16.mxu1 %v941_v16 }
 0x23e   : > { %1742 = vmatpush3.bf16.msra.mxu0 %v941_v16  ;;  %1830 = vmatpush3.bf16.msra.mxu1 %v941_v16 }
 0x23f   : > { %1743 = vmatprep.subr.bf16.mxu0 %v942_v17  ;;  %1823 = vmatprep.subr.bf16.mxu1 %v942_v17 }
 0x242   : > { %1744 = vmatpush3.bf16.msra.mxu0 %v942_v17  ;;  %1831 = vmatpush3.bf16.msra.mxu1 %v942_v17 }
 0x243   : > { %1745 = vmatprep.subr.bf16.mxu0 %v943_v18  ;;  %1824 = vmatprep.subr.bf16.mxu1 %v943_v18 }
 0x246   : > { %1746 = vmatpush3.bf16.msra.mxu0 %v943_v18  ;;  %1832 = vmatpush3.bf16.msra.mxu1 %v943_v18 }
 0x247   : > { %1747 = vmatprep.subr.bf16.mxu0 %v944_v19  ;;  %1825 = vmatprep.subr.bf16.mxu1 %v944_v19 }
 0x24a   : > { %1748 = vmatpush3.bf16.msra.mxu0 %v944_v19  ;;  %1833 = vmatpush3.bf16.msra.mxu1 %v944_v19 }
 0x24b   : > { %1749 = vmatprep.subr.bf16.mxu0 %v945_v20  ;;  %1826 = vmatprep.subr.bf16.mxu1 %v945_v20 }
 0x24e   : > { %1750 = vmatpush3.bf16.msra.mxu0 %v945_v20  ;;  %1834 = vmatpush3.bf16.msra.mxu1 %v945_v20 }
 0x251   : > { %1752 = vmatmul.mubr.bf16.vlgmr.msra.gmra.mrb[0].mxu0 %v1906_v21  ;;  %1760 = vmatmul.mubr.bf16.vlgmr.msra.gmra.mrb[0].mxu1 %v1907_v22 }
 0x252   : > { %1755 = vmatprep.mubr.bf16.mxu0 %v1908_v23  ;;  %1763 = vmatprep.mubr.bf16.mxu1 %v1910_v24 }
 0x259   : > { %1756 = vmatmul.mubr.bf16.gmra.mrb[4].mxu0 %v1909_v25  ;;  %1764 = vmatmul.mubr.bf16.gmra.mrb[4].mxu1 %v1911_v26 }
 0x324   : > { %v1753_v32 = vpop.f32.mrb[0].mxu0  ;;  %v1761_v33 = vpop.f32.mrb[0].mxu1 }
 0x325   : > { %v1041_v34 = vadd.f32 %v1753_v32, %v949_v31  ;;  %v2196_v35 = vadd.f32 %v1761_v33, %v949_v31  ;;  %v1032_v36 = vpop.f32.mrb[1].mxu0  ;;  %v1064_v37 = vpop.f32.mrb[1].mxu1 }
 0x326   : > { %v1754_v38 = vpop.f32.mrb[2].mxu0  ;;  %v1762_v39 = vpop.f32.mrb[2].mxu1  ;;  %v1033_v42 = vadd.f32 %v1032_v36, %v949_v31  ;;  %v2199_v46 = vadd.f32 %v1064_v37, %v949_v31 }
 0x327   : > { %v1035_v40 = vpop.f32.mrb[3].mxu0  ;;  %v1067_v41 = vpop.f32.mrb[3].mxu1  ;;  %1120 = vadd.xlane.f32.xlu0 %v2196_v35  ;;  %1104 = vadd.xlane.f32.xlu1 %v1041_v34  ;;  %v1044_v43 = vadd.f32 %v1754_v38, %v949_v31  ;;  %v2201_v47 = vadd.f32 %v1762_v39, %v949_v31 }
 0x328   : > { %v2205_v54 = vadd.f32 %v1035_v40, %v949_v31  ;;  %v2207_v55 = vadd.f32 %v1067_v41, %v949_v31 }
 0x32b   : > { %1106 = vadd.xlane.f32.xlu1 %v1044_v43  ;;  %1100 = vadd.xlane.f32.xlu0 %v1033_v42 }
 0x32c   : > { %v1757_v44 = vpop.f32.mrb[4].mxu0  ;;  %v1765_v45 = vpop.f32.mrb[4].mxu1 }
 0x32d   : > { %v1048_v48 = vpop.f32.mrb[5].mxu0  ;;  %v1080_v49 = vpop.f32.mrb[5].mxu1  ;;  %v2209_v56 = vadd.f32 %v1757_v44, %v949_v31  ;;  %v2229_v62 = vadd.f32 %v1765_v45, %v949_v31 }
 0x32e   : > { %v1758_v50 = vpop.f32.mrb[6].mxu0  ;;  %v1766_v51 = vpop.f32.mrb[6].mxu1  ;;  %v2217_v58 = vadd.f32 %v1048_v48, %v949_v31  ;;  %v2221_v60 = vadd.f32 %v1080_v49, %v949_v31 }
 0x32f   : > { %1122 = vadd.xlane.f32.xlu1 %v2201_v47  ;;  %1116 = vadd.xlane.f32.xlu0 %v2199_v46  ;;  %v1051_v52 = vpop.f32.mrb[7].mxu0  ;;  %v1083_v53 = vpop.f32.mrb[7].mxu1  ;;  %v2213_v57 = vadd.f32 %v1758_v50, %v949_v31  ;;  %v2231_v63 = vadd.f32 %v1766_v51, %v949_v31 }
 0x330   : > { %v2219_v59 = vadd.f32 %v1051_v52, %v949_v31  ;;  %v2225_v61 = vadd.f32 %v1083_v53, %v949_v31 }
 0x333   : > { %1118 = vadd.xlane.f32.xlu1 %v2207_v55  ;;  %1102 = vadd.xlane.f32.xlu0 %v2205_v54 }
 0x337   : > { %1114 = vadd.xlane.f32.xlu1 %v2213_v57  ;;  %1112 = vadd.xlane.f32.xlu0 %v2209_v56 }
 0x33b   : > { %1110 = vadd.xlane.f32.xlu1 %v2219_v59  ;;  %1108 = vadd.xlane.f32.xlu0 %v2217_v58 }
 0x33f   : > { %1126 = vadd.xlane.f32.xlu1 %v2225_v61  ;;  %1124 = vadd.xlane.f32.xlu0 %v2221_v60 }
 0x343   : > { %1130 = vadd.xlane.f32.xlu1 %v2231_v63  ;;  %1128 = vadd.xlane.f32.xlu0 %v2229_v62 }
 0x3b4   : > { %v1121_v1 = vpop.xlane.xlu0 %1120  ;;  %v1105_v2 = vpop.xlane.xlu1 %1104 }
 0x3b5   : > { %v1142_v3 = vmul.f32 0.03125, %v1121_v1  ;;  %v1134_v4 = vmul.f32 0.03125, %v1105_v2 }
 0x3b7   : > { %v1158_v7 = vsub.f32 %v2196_v35, %v1142_v3  ;;  %v1150_v8 = vsub.f32 %v1041_v34, %v1134_v4 }
 0x3b8   : > { %v1107_v9 = vpop.xlane.xlu1 %1106  ;;  %v1101_v10 = vpop.xlane.xlu0 %1100 }
 0x3b9   : > { %v1135_v11 = vmul.f32 0.03125, %v1107_v9  ;;  %v1132_v12 = vmul.f32 0.03125, %v1101_v10  ;;  %v2239_v13 = vmul.f32 %v2235_v6, %v1150_v8  ;;  %v2244_v17 = vmul.f32 %v2235_v6, %v1158_v7 }
 0x3bb   : > { %v1151_v14 = vsub.f32 %v1044_v43, %v1135_v11  ;;  %v1148_v15 = vsub.f32 %v1033_v42, %v1132_v12  ;;  %v1182_v16 = vmul.f32 %v2239_v13, %v2239_v13  ;;  %v1190_v27 = vmul.f32 %v2244_v17, %v2244_v17 }
 0x3bc   : > { %v1123_v18 = vpop.xlane.xlu1 %1122  ;;  %v1117_v19 = vpop.xlane.xlu0 %1116 }
 0x3bd   : > { %v1143_v20 = vmul.f32 0.03125, %v1123_v18  ;;  %v1140_v21 = vmul.f32 0.03125, %v1117_v19  ;;  %1200 = vadd.xlane.f32.xlu0 %v1182_v16  ;;  %v2247_v22 = vmul.f32 %v2235_v6, %v1151_v14  ;;  %v2250_v23 = vmul.f32 %v2235_v6, %v1148_v15 }
 0x3bf   : > { %v1159_v24 = vsub.f32 %v2201_v47, %v1143_v20  ;;  %v1156_v25 = vsub.f32 %v2199_v46, %v1140_v21  ;;  %v1183_v26 = vmul.f32 %v2247_v22, %v2247_v22  ;;  %v1180_v35 = vmul.f32 %v2250_v23, %v2250_v23 }
 0x3c0   : > { %v1119_v29 = vpop.xlane.xlu1 %1118  ;;  %v1103_v31 = vpop.xlane.xlu0 %1102 }
 0x3c1   : > { %v1141_v32 = vmul.f32 0.03125, %v1119_v29  ;;  %v1133_v33 = vmul.f32 0.03125, %v1103_v31  ;;  %1202 = vadd.xlane.f32.xlu1 %v1183_v26  ;;  %1216 = vadd.xlane.f32.xlu0 %v1190_v27  ;;  %v2259_v34 = vmul.f32 %v2235_v6, %v1159_v24  ;;  %v2268_v39 = vmul.f32 %v2235_v6, %v1156_v25 }
 0x3c3   : > { %v1157_v36 = vsub.f32 %v2207_v55, %v1141_v32  ;;  %v1149_v37 = vsub.f32 %v2205_v54, %v1133_v33  ;;  %v1191_v38 = vmul.f32 %v2259_v34, %v2259_v34  ;;  %v1188_v48 = vmul.f32 %v2268_v39, %v2268_v39 }
 0x3c4   : > { %v1115_v40 = vpop.xlane.xlu1 %1114  ;;  %v1113_v41 = vpop.xlane.xlu0 %1112 }
 0x3c5   : > { %v1139_v42 = vmul.f32 0.03125, %v1115_v40  ;;  %v1138_v43 = vmul.f32 0.03125, %v1113_v41  ;;  %1218 = vadd.xlane.f32.xlu1 %v1191_v38  ;;  %1196 = vadd.xlane.f32.xlu0 %v1180_v35  ;;  %v2271_v44 = vmul.f32 %v2235_v6, %v1149_v37  ;;  %v2274_v45 = vmul.f32 %v2235_v6, %v1157_v36 }
 0x3c7   : > { %v1155_v46 = vsub.f32 %v2213_v57, %v1139_v42  ;;  %v1154_v47 = vsub.f32 %v2209_v56, %v1138_v43  ;;  %v1181_v49 = vmul.f32 %v2271_v44, %v2271_v44  ;;  %v1189_v55 = vmul.f32 %v2274_v45, %v2274_v45 }
 0x3c8   : > { %v1111_v50 = vpop.xlane.xlu1 %1110  ;;  %v1109_v51 = vpop.xlane.xlu0 %1108  ;;  %v1294_v42 = vsub.s32 1, %v2189_v28 }
 0x3c9   : > { %v1137_v52 = vmul.f32 0.03125, %v1111_v50  ;;  %v1136_v53 = vmul.f32 0.03125, %v1109_v51  ;;  %1212 = vadd.xlane.f32.xlu0 %v1188_v48  ;;  %1198 = vadd.xlane.f32.xlu1 %v1181_v49  ;;  %v2283_v54 = vmul.f32 %v2235_v6, %v1154_v47  ;;  %v2292_v1 = vmul.f32 %v2235_v6, %v1155_v46 }
 0x3ca   : > { %v1314_v47 = vsub.s32 2, %v2189_v28 }
 0x3cb   : > { %v1153_v56 = vsub.f32 %v2219_v59, %v1137_v52  ;;  %v1152_v57 = vsub.f32 %v2217_v58, %v1136_v53  ;;  %v1186_v0 = vmul.f32 %v2283_v54, %v2283_v54  ;;  %v1187_v9 = vmul.f32 %v2292_v1, %v2292_v1 }
 0x3cc   : > { %v1127_v2 = vpop.xlane.xlu1 %1126  ;;  %v1125_v3 = vpop.xlane.xlu0 %1124  ;;  %v2333_v52 = vrot.slane %v2193_v30, %v1294_v42 }
 0x3cd   : > { %v1145_v4 = vmul.f32 0.03125, %v1127_v2  ;;  %v1144_v5 = vmul.f32 0.03125, %v1125_v3  ;;  %1214 = vadd.xlane.f32.xlu1 %v1189_v55  ;;  %1208 = vadd.xlane.f32.xlu0 %v1186_v0  ;;  %v2295_v7 = vmul.f32 %v2235_v6, %v1152_v57  ;;  %v2298_v8 = vmul.f32 %v2235_v6, %v1153_v56 }
 0x3ce   : > { %v2336_v57 = vrot.slane %v2193_v30, %v1314_v47 }
 0x3cf   : > { %v1161_v58 = vsub.f32 %v2225_v61, %v1145_v4  ;;  %v1160_v59 = vsub.f32 %v2221_v60, %v1144_v5  ;;  %v1184_v10 = vmul.f32 %v2295_v7, %v2295_v7  ;;  %v1185_v61 = vmul.f32 %v2298_v8, %v2298_v8 }
 0x3d0   : > { %v1131_v11 = vpop.xlane.xlu1 %1130  ;;  %v1129_v12 = vpop.xlane.xlu0 %1128 }
 0x3d1   : > { %v1147_v14 = vmul.f32 0.03125, %v1131_v11  ;;  %v1146_v15 = vmul.f32 0.03125, %v1129_v12  ;;  %1210 = vadd.xlane.f32.xlu1 %v1187_v9  ;;  %1204 = vadd.xlane.f32.xlu0 %v1184_v10  ;;  %v2307_v16 = vmul.f32 %v2235_v6, %v1160_v59  ;;  %v2316_v20 = vmul.f32 %v2235_v6, %v1161_v58 }
 0x3d3   : > { %v1163_v60 = vsub.f32 %v2231_v63, %v1147_v14  ;;  %v1162_v18 = vsub.f32 %v2229_v62, %v1146_v15  ;;  %v1192_v19 = vmul.f32 %v2307_v16, %v2307_v16  ;;  %v1193_v24 = vmul.f32 %v2316_v20, %v2316_v20  ;;  %v1352_v15 = vld [vmem:[#allocation2 + $0x10] sm:$0xff] }
 0x3d5   : > { %1206 = vadd.xlane.f32.xlu1 %v1185_v61  ;;  %1220 = vadd.xlane.f32.xlu0 %v1192_v19  ;;  %v2319_v21 = vmul.f32 %v2235_v6, %v1162_v18  ;;  %v2326_v63 = vmul.f32 %v2235_v6, %v1163_v60 }
 0x3d7   : > { %v1194_v25 = vmul.f32 %v2319_v21, %v2319_v21  ;;  %v1195_v62 = vmul.f32 %v2326_v63, %v2326_v63 }
 0x3d9   : > { %1222 = vadd.xlane.f32.xlu1 %v1193_v24  ;;  %1224 = vadd.xlane.f32.xlu0 %v1194_v25 }
 0x3dd   : > { %1226 = vadd.xlane.f32.xlu1 %v1195_v62 }
 0x44a   : > { %v1201_v26 = vpop.xlane.xlu0 %1200 }
 0x44b   : > { %v1230_v27 = vmul.f32 0.03125, %v1201_v26 }
 0x44d   : > { %v1246_v29 = vadd.f32 1e-05, %v1230_v27 }
 0x44e   : > { %v1203_v31 = vpop.xlane.xlu1 %1202  ;;  %v1217_v32 = vpop.xlane.xlu0 %1216 }
 0x44f   : > { %1912 = vrsqrt.f32 %v1246_v29  ;;  %v1231_v33 = vmul.f32 0.03125, %v1203_v31  ;;  %v1238_v35 = vmul.f32 0.03125, %v1217_v32 }
 0x451   : > { %v1247_v36 = vadd.f32 1e-05, %v1231_v33  ;;  %v1254_v37 = vadd.f32 1e-05, %v1238_v35  ;;  %v1353_v33 = vld [vmem:[#allocation2 + $0x18] sm:$0xff] }
 0x452   : > { %v1219_v38 = vpop.xlane.xlu1 %1218  ;;  %v1197_v40 = vpop.xlane.xlu0 %1196 }
 0x453   : > { %1914 = vrsqrt.f32 %v1247_v36  ;;  %v1239_v6 = vmul.f32 0.03125, %v1219_v38  ;;  %v1228_v41 = vmul.f32 0.03125, %v1197_v40  ;;  %v1360_v40 = vld [vmem:[#allocation2 + $0x50] sm:$0xff] }
 0x454   : > { %1916 = vrsqrt.f32 %v1254_v37 }
 0x455   : > { %v1255_v43 = vadd.f32 1e-05, %v1239_v6  ;;  %v1244_v46 = vadd.f32 1e-05, %v1228_v41 }
 0x456   : > { %v1199_v48 = vpop.xlane.xlu1 %1198  ;;  %v1213_v49 = vpop.xlane.xlu0 %1212 }
 0x457   : > { %1918 = vrsqrt.f32 %v1255_v43  ;;  %v1229_v50 = vmul.f32 0.03125, %v1199_v48  ;;  %v1236_v51 = vmul.f32 0.03125, %v1213_v49 }
 0x458   : > { %1920 = vrsqrt.f32 %v1244_v46 }
 0x459   : > { %v1913_v53 = vpop.eup %1912  ;;  %v1245_v55 = vadd.f32 1e-05, %v1229_v50  ;;  %v1252_v56 = vadd.f32 1e-05, %v1236_v51 }
 0x45a   : > { %v1278_v0 = vmul.f32 %v1913_v53, %v2239_v13  ;;  %v1215_v2 = vpop.xlane.xlu1 %1214  ;;  %v1209_v3 = vpop.xlane.xlu0 %1208 }
 0x45b   : > { %1922 = vrsqrt.f32 %v1245_v55  ;;  %v1237_v28 = vmul.f32 0.03125, %v1215_v2  ;;  %v1234_v4 = vmul.f32 0.03125, %v1209_v3 }
 0x45c   : > { %v1298_v5 = vmul.f32 %v2333_v52, %v1278_v0  ;;  %1924 = vrsqrt.f32 %v1252_v56  ;;  %v1361_v56 = vld [vmem:[#allocation2 + $0x58] sm:$0xff] }
 0x45d   : > { %v1915_v58 = vpop.eup %1914  ;;  %v1253_v59 = vadd.f32 1e-05, %v1237_v28  ;;  %v1250_v9 = vadd.f32 1e-05, %v1234_v4  ;;  %v1350_v28 = vld [vmem:[#allocation2] sm:$0xff] }
 0x45e   : > { %v1917_v10 = vpop.eup %1916  ;;  %v1318_v11 = vadd.f32 %v2336_v57, %v1298_v5  ;;  %v1279_v12 = vmul.f32 %v1915_v58, %v2247_v22  ;;  %v1211_v30 = vpop.xlane.xlu1 %1210 }
 0x45f   : > { %v1205_v14 = vpop.xlane.xlu0 %1204  ;;  %v1286_v13 = vmul.f32 %v1917_v10, %v2244_v17  ;;  %1926 = vrsqrt.f32 %v1253_v59  ;;  %v1235_v61 = vmul.f32 0.03125, %v1211_v30 }
 0x460   : > { %v1232_v60 = vmul.f32 0.03125, %v1205_v14  ;;  %v2343_v18 = vmax.f32 %v1318_v11, 0.0  ;;  %v1299_v19 = vmul.f32 %v2333_v52, %v1279_v12  ;;  %1928 = vrsqrt.f32 %v1250_v9 }
 0x461   : > { %v1919_v24 = vpop.eup %1918  ;;  %v1306_v25 = vmul.f32 %v2333_v52, %v1286_v13  ;;  %v1251_v62 = vadd.f32 1e-05, %v1235_v61  ;;  %v1351_v13 = vld [vmem:[#allocation2 + $0x8] sm:$0xff] }
 0x462   : > { %v1248_v26 = vadd.f32 1e-05, %v1232_v60  ;;  %v1921_v27 = vpop.eup %1920  ;;  %v1368_v22 = vadd.f32 %v1352_v15, %v2343_v18  ;;  %v1319_v29 = vadd.f32 %v2336_v57, %v1299_v19  ;;  %v1287_v17 = vmul.f32 %v1919_v24, %v2259_v34  ;;  %v1207_v31 = vpop.xlane.xlu1 %1206  ;;  %1403 = vst [vmem:[%s2522_s7 + $0x10] sm:$0xff] (!%p1652_p8), %v2343_v18 }
 0x463   : > { %v1221_v32 = vpop.xlane.xlu0 %1220  ;;  %v1326_v35 = vadd.f32 %v2336_v57, %v1306_v25  ;;  %v1276_v36 = vmul.f32 %v1921_v27, %v2250_v23  ;;  %1930 = vrsqrt.f32 %v1251_v62  ;;  %v1233_v37 = vmul.f32 0.03125, %v1207_v31  ;;  %v1358_v25 = vld [vmem:[#allocation2 + $0x40] sm:$0xff] }
 0x464   : > { %1384 = vst [vmem:[#allocation2 + $0x10] sm:$0xff] %v1368_v22  ;;  %v2352_v38 = vmax.f32 %v1319_v29, 0.0  ;;  %v1307_v6 = vmul.f32 %v2333_v52, %v1287_v17  ;;  %1932 = vrsqrt.f32 %v1248_v26  ;;  %v1240_v41 = vmul.f32 0.03125, %v1221_v32 }
 0x465   : > { %v1923_v42 = vpop.eup %1922  ;;  %v2355_v43 = vmax.f32 %v1326_v35, 0.0  ;;  %v1296_v34 = vmul.f32 %v2333_v52, %v1276_v36  ;;  %v1249_v46 = vadd.f32 1e-05, %v1233_v37  ;;  %v1359_v35 = vld [vmem:[#allocation2 + $0x48] sm:$0xff] }
 0x466   : > { %v1925_v47 = vpop.eup %1924  ;;  %v1369_v48 = vadd.f32 %v1353_v33, %v2352_v38  ;;  %v1327_v23 = vadd.f32 %v2336_v57, %v1307_v6  ;;  %v1277_v49 = vmul.f32 %v1923_v42, %v2271_v44  ;;  %v1256_v50 = vadd.f32 1e-05, %v1240_v41  ;;  %v1223_v51 = vpop.xlane.xlu1 %1222  ;;  %v1356_v6 = vld [vmem:[#allocation2 + $0x30] sm:$0xff]  ;;  %1404 = vst [vmem:[%s2522_s7 + $0x18] sm:$0xff] (!%p1652_p8), %v2352_v38 }
 0x467   : > { %v1225_v53 = vpop.xlane.xlu0 %1224  ;;  %v1376_v55 = vadd.f32 %v1360_v40, %v2355_v43  ;;  %v1316_v0 = vadd.f32 %v2336_v57, %v1296_v34  ;;  %v1284_v2 = vmul.f32 %v1925_v47, %v2268_v39  ;;  %1934 = vrsqrt.f32 %v1249_v46  ;;  %1411 = vst [vmem:[%s2522_s7 + $0x50] sm:$0xff] (!%p1652_p8), %v2355_v43 }
 0x468   : > { %1385 = vst [vmem:[#allocation2 + $0x18] sm:$0xff] %v1369_v48  ;;  %v2364_v3 = vmax.f32 %v1327_v23, 0.0  ;;  %v1297_v4 = vmul.f32 %v2333_v52, %v1277_v49  ;;  %1936 = vrsqrt.f32 %v1256_v50  ;;  %v1241_v5 = vmul.f32 0.03125, %v1223_v51  ;;  %v1357_v49 = vld [vmem:[#allocation2 + $0x38] sm:$0xff] }
 0x469   : > { %v1927_v44 = vpop.eup %1926  ;;  %1392 = vst [vmem:[#allocation2 + $0x50] sm:$0xff] %v1376_v55  ;;  %v2367_v58 = vmax.f32 %v1316_v0, 0.0  ;;  %v1304_v59 = vmul.f32 %v2333_v52, %v1284_v2  ;;  %v1242_v9 = vmul.f32 0.03125, %v1225_v53  ;;  %v1354_v55 = vld [vmem:[#allocation2 + $0x20] sm:$0xff] }
 0x46a   : > { %v1929_v10 = vpop.eup %1928  ;;  %v1377_v11 = vadd.f32 %v1361_v56, %v2364_v3  ;;  %v1317_v39 = vadd.f32 %v2336_v57, %v1297_v4  ;;  %v1285_v12 = vmul.f32 %v1927_v44, %v2274_v45  ;;  %v1257_v30 = vadd.f32 1e-05, %v1241_v5  ;;  %v1227_v14 = vpop.xlane.xlu1 %1226  ;;  %1412 = vst [vmem:[%s2522_s7 + $0x58] sm:$0xff] (!%p1652_p8), %v2364_v3 }
 0x46b   : > { %v1366_v15 = vadd.f32 %v1350_v28, %v2367_v58  ;;  %v1324_v61 = vadd.f32 %v2336_v57, %v1304_v59  ;;  %v1282_v60 = vmul.f32 %v1929_v10, %v2283_v54  ;;  %v1258_v19 = vadd.f32 1e-05, %v1242_v9  ;;  %1401 = vst [vmem:[%s2522_s7] sm:$0xff] (!%p1652_p8), %v2367_v58 }
 0x46c   : > { %1393 = vst [vmem:[#allocation2 + $0x58] sm:$0xff] %v1377_v11  ;;  %v2376_v24 = vmax.f32 %v1317_v39, 0.0  ;;  %v1305_v62 = vmul.f32 %v2333_v52, %v1285_v12  ;;  %1938 = vrsqrt.f32 %v1257_v30  ;;  %v1243_v26 = vmul.f32 0.03125, %v1227_v14  ;;  %v1362_v11 = vld [vmem:[#allocation2 + $0x60] sm:$0xff] }
 0x46d   : > { %v1931_v27 = vpop.eup %1930  ;;  %1382 = vst [vmem:[#allocation2] sm:$0xff] %v1366_v15  ;;  %v2379_v45 = vmax.f32 %v1324_v61, 0.0  ;;  %v1302_v22 = vmul.f32 %v2333_v52, %v1282_v60  ;;  %1940 = vrsqrt.f32 %v1258_v19  ;;  %v1363_v19 = vld [vmem:[#allocation2 + $0x68] sm:$0xff] }
 0x46e   : > { %v1933_v29 = vpop.eup %1932  ;;  %v1367_v17 = vadd.f32 %v1351_v13, %v2376_v24  ;;  %v1325_v54 = vadd.f32 %v2336_v57, %v1305_v62  ;;  %v1283_v31 = vmul.f32 %v1931_v27, %v2292_v1  ;;  %v1259_v32 = vadd.f32 1e-05, %v1243_v26  ;;  %v1364_v62 = vld [vmem:[#allocation2 + $0x70] sm:$0xff]  ;;  %1402 = vst [vmem:[%s2522_s7 + $0x8] sm:$0xff] (!%p1652_p8), %v2376_v24 }
 0x46f   : > { %v1374_v33 = vadd.f32 %v1358_v25, %v2379_v45  ;;  %v1322_v36 = vadd.f32 %v2336_v57, %v1302_v22  ;;  %v1280_v37 = vmul.f32 %v1933_v29, %v2295_v7  ;;  %1409 = vst [vmem:[%s2522_s7 + $0x40] sm:$0xff] (!%p1652_p8), %v2379_v45 }
 0x470   : > { %1383 = vst [vmem:[#allocation2 + $0x8] sm:$0xff] %v1367_v17  ;;  %v2388_v40 = vmax.f32 %v1325_v54, 0.0  ;;  %v1303_v41 = vmul.f32 %v2333_v52, %v1283_v31  ;;  %1942 = vrsqrt.f32 %v1259_v32  ;;  %v1365_v54 = vld [vmem:[#allocation2 + $0x78] sm:$0xff] }
 0x471   : > { %v1935_v42 = vpop.eup %1934  ;;  %1390 = vst [vmem:[#allocation2 + $0x40] sm:$0xff] %v1374_v33  ;;  %v2391_v34 = vmax.f32 %v1322_v36, 0.0  ;;  %v1300_v1 = vmul.f32 %v2333_v52, %v1280_v37  ;;  %v1944_v36 = vld [vmem:[%s2516_s1] sm:$0xff] (!%p1652_p8)  }
 0x472   : > { %v1937_v46 = vpop.eup %1936  ;;  %v1375_v47 = vadd.f32 %v1359_v35, %v2388_v40  ;;  %v1323_v48 = vadd.f32 %v2336_v57, %v1303_v41  ;;  %v1281_v7 = vmul.f32 %v1935_v42, %v2298_v8  ;;  %1410 = vst [vmem:[%s2522_s7 + $0x48] sm:$0xff] (!%p1652_p8), %v2388_v40 }
 0x473   : > { %v1372_v23 = vadd.f32 %v1356_v6, %v2391_v34  ;;  %v1320_v50 = vadd.f32 %v2336_v57, %v1300_v1  ;;  %v1288_v51 = vmul.f32 %v1937_v46, %v2307_v16  ;;  %v1355_v16 = vld [vmem:[#allocation2 + $0x28] sm:$0xff]  ;;  %1407 = vst [vmem:[%s2522_s7 + $0x30] sm:$0xff] (!%p1652_p8), %v2391_v34 }
 0x474   : > { %1391 = vst [vmem:[#allocation2 + $0x48] sm:$0xff] %v1375_v47  ;;  %v2400_v53 = vmax.f32 %v1323_v48, 0.0  ;;  %v1301_v56 = vmul.f32 %v2333_v52, %v1281_v7 }
 0x475   : > { %1388 = vst [vmem:[#allocation2 + $0x30] sm:$0xff] %v1372_v23  ;;  %v2403_v0 = vmax.f32 %v1320_v50, 0.0  ;;  %v1308_v2 = vmul.f32 %v2333_v52, %v1288_v51 }
 0x476   : > { %v1939_v28 = vpop.eup %1938  ;;  %v1373_v8 = vadd.f32 %v1357_v49, %v2400_v53  ;;  %v1321_v4 = vadd.f32 %v2336_v57, %v1301_v56  ;;  %1408 = vst [vmem:[%s2522_s7 + $0x38] sm:$0xff] (!%p1652_p8), %v2400_v53  ;;  %v1424_v35 = vpack.c.bf16 (!%p1652_p8), %v2400_v53, %v2391_v34 }
 0x477   : > { %v1941_v5 = vpop.eup %1940  ;;  %v1370_v44 = vadd.f32 %v1354_v55, %v2403_v0  ;;  %v1328_v59 = vadd.f32 %v2336_v57, %v1308_v2  ;;  %v1289_v9 = vmul.f32 %v1939_v28, %v2316_v20  ;;  %1405 = vst [vmem:[%s2522_s7 + $0x20] sm:$0xff] (!%p1652_p8), %v2403_v0 }
 0x478   : > { %1389 = vst [vmem:[#allocation2 + $0x38] sm:$0xff] %v1373_v8  ;;  %v1337_v10 = vmax.f32 %v1321_v4, 0.0  ;;  %v1290_v39 = vmul.f32 %v1941_v5, %v2319_v21 }
 0x479   : > { %1386 = vst [vmem:[#allocation2 + $0x20] sm:$0xff] %v1370_v44  ;;  %v2412_v12 = vmax.f32 %v1328_v59, 0.0  ;;  %v1309_v30 = vmul.f32 %v2333_v52, %v1289_v9 }
 0x47a   : > { %v1943_v14 = vpop.eup %1942  ;;  %v1371_v15 = vadd.f32 %v1355_v16, %v1337_v10  ;;  %v1310_v13 = vmul.f32 %v2333_v52, %v1290_v39  ;;  %1406 = vst [vmem:[%s2522_s7 + $0x28] sm:$0xff] (!%p1652_p8), %v1337_v10  ;;  %v1423_v33 = vpack.c.bf16 (!%p1652_p8), %v1337_v10, %v2403_v0 }
 0x47b   : > { %v1378_v61 = vadd.f32 %v1362_v11, %v2412_v12  ;;  %v1329_v60 = vadd.f32 %v2336_v57, %v1309_v30  ;;  %v1291_v20 = vmul.f32 %v1943_v14, %v2326_v63  ;;  %1413 = vst [vmem:[%s2522_s7 + $0x60] sm:$0xff] (!%p1652_p8), %v2412_v12  ;;  %v1421_v63 = vpack.c.bf16 (!%p1652_p8), %v2376_v24, %v2367_v58 }
 0x47c   : > { %1387 = vst [vmem:[#allocation2 + $0x28] sm:$0xff] %v1371_v15  ;;  %v1330_v25 = vadd.f32 %v2336_v57, %v1310_v13  ;;  %v1425_v58 = vpack.c.bf16 (!%p1652_p8), %v2388_v40, %v2379_v45  ;;  %v1417_v45 = vld [vmem:[#allocation4] sm:$0xff] (!%p1652_p8)  ;;  %v1418_v40 = vld [vmem:[#allocation4 + $0x8] sm:$0xff] (!%p1652_p8) }
 0x47d   : > { %1394 = vst [vmem:[#allocation2 + $0x60] sm:$0xff] %v1378_v61  ;;  %v1345_v21 = vmax.f32 %v1329_v60, 0.0  ;;  %v1311_v26 = vmul.f32 %v2333_v52, %v1291_v20  ;;  %v1972_v52 = vmov (!%p1652_p8), 0.0  }
 0x47e   : > { %v1346_v27 = vmax.f32 %v1330_v25, 0.0  ;;  %1767 = vmatprep.subr.bf16.mxu0 (!%p1652_p8), %v1972_v52  ;;  %1783 = vmatprep.mubr.msk.bf16.mxu0 (!%p1652_p8), %vm1973_vm1, %v1972_v52 }
 0x47f   : > { %v1379_v22 = vadd.f32 %v1363_v19, %v1345_v21  ;;  %v1331_v29 = vadd.f32 %v2336_v57, %v1311_v26  ;;  %1400 = sbr.rel (%p1652_p8) target bundleno = 1399 (0x577), region = 64  ;;  %1414 = vst [vmem:[%s2522_s7 + $0x68] sm:$0xff] (!%p1652_p8), %v1345_v21  ;;  %1768 = vmatpush3.bf16.msra.mxu0 (!%p1652_p8), %v1421_v63  ;;  %v1422_v57 = vpack.c.bf16 (!%p1652_p8), %v2352_v38, %v2343_v18 }
 0x480   : > { %v1380_v17 = vadd.f32 %v1364_v62, %v1346_v27  ;;  %1415 = vst [vmem:[%s2522_s7 + $0x70] sm:$0xff] (!%p1652_p8), %v1346_v27  ;;  %1769 = vmatprep.subr.bf16.mxu0 (!%p1652_p8), %v1972_v52  ;;  %v1426_v18 = vpack.c.bf16 (!%p1652_p8), %v2364_v3, %v2355_v43  ;;  %v1427_v38 = vpack.c.bf16 (!%p1652_p8), %v1345_v21, %v2412_v12 }
 0x481   : > { %1395 = vst [vmem:[#allocation2 + $0x68] sm:$0xff] %v1379_v22  ;;  %v1347_v31 = vmax.f32 %v1331_v29, 0.0 }
 0x482   : > { %1396 = vst [vmem:[#allocation2 + $0x70] sm:$0xff] %v1380_v17 }
 0x483   : > { %v1381_v32 = vadd.f32 %v1365_v54, %v1347_v31  ;;  %1416 = vst [vmem:[%s2522_s7 + $0x78] sm:$0xff] (!%p1652_p8), %v1347_v31  ;;  %1770 = vmatpush3.bf16.msra.mxu0 (!%p1652_p8), %v1422_v57  ;;  %v1428_v24 = vpack.c.bf16 (!%p1652_p8), %v1347_v31, %v1346_v27 }
 0x484   : > { %1771 = vmatprep.subr.bf16.mxu0 (!%p1652_p8), %v1972_v52 }
 0x485   : > { %1397 = vst [vmem:[#allocation2 + $0x78] sm:$0xff] %v1381_v32 }
 0x487   : > { %1772 = vmatpush3.bf16.msra.mxu0 %v1423_v33 }
 0x488   : > { %1773 = vmatprep.subr.bf16.mxu0 %v1972_v52 }
 0x48b   : > { %1774 = vmatpush3.bf16.msra.mxu0 %v1424_v35 }
 0x48c   : > { %1775 = vmatprep.subr.bf16.mxu0 %v1972_v52 }
 0x48f   : > { %1776 = vmatpush3.bf16.msra.mxu0 %v1425_v58 }
 0x490   : > { %1777 = vmatprep.subr.bf16.mxu0 %v1972_v52 }
 0x493   : > { %1778 = vmatpush3.bf16.msra.mxu0 %v1426_v18 }
 0x494   : > { %1779 = vmatprep.subr.bf16.mxu0 %v1972_v52 }
 0x497   : > { %1780 = vmatpush3.bf16.msra.mxu0 %v1427_v38 }
 0x498   : > { %1781 = vmatprep.subr.bf16.mxu0 %v1972_v52 }
 0x49b   : > { %1782 = vmatpush3.bf16.msra.mxu0 %v1428_v24 }
 0x49e   : > { %1784 = vmatmul.mubr.bf16.vlgmr.msra.gmra.mrb[0].mxu0 %v1944_v36 }
 0x571   : > { %v1469_v37 = vpop.f32.mrb[0].mxu0 }
 0x572   : > { %v1476_v6 = vadd.f32 %v1469_v37, %v1417_v45  ;;  %v1785_v41 = vpop.f32.mrb[1].mxu0 }
 0x573   : > { %v1472_v43 = vpop.f32.mrb[2].mxu0 }
 0x574   : > { %1478 = vst [vmem:[#allocation4] sm:$0xff] %v1476_v6  ;;  %v1477_v3 = vadd.f32 %v1472_v43, %v1418_v40  ;;  %v1786_v42 = vpop.f32.mrb[3].mxu0 }
 0x576   : > { %1479 = vst [vmem:[#allocation4 + $0x8] sm:$0xff] %v1477_v3 }
 0x577 PF: > { %1481 = sbr.rel (!%p914_p7) target bundleno = 1407 (0x57f), region = 68 }
 0x57b   : > { %v1482_v34 = vld [vmem:[#allocation4] sm:$0xff] (%p914_p7) }
 0x57c   : > { %1484 = vst [vmem:[%s2523_s8] sm:$0xff] (%p914_p7), %v1482_v34 }
 0x57d   : > { %v1483_v1 = vld [vmem:[#allocation4 + $0x8] sm:$0xff] (%p914_p7) }
 0x57e   : > { %1485 = vst [vmem:[%s2523_s8 + $0x8] sm:$0xff] %v1483_v1 }
 0x57f PF: > { %s19_s29 = sadd.s32 1, %s1967_s29   ;;  %s2524_s27 = smov %s1963_s28 }
 0x580   : > { %p16_p9 = scmp.ge.s32.totalorder %s19_s29, 4   ;;  %s2525_s28 = smov %s2527_s30 }
 0x582   :  { %18 = sbr.rel (!%p16_p9) target bundleno = 2 (0x2), region = 116 }

</bundles_post_ra>
